<compile_context>
chip_gen: v7x
topology: tpu7x:2x2x1
jax: 0.10.0
libtpu: 0.0.40
codegen_flags: <defaults>
</compile_context>

<pallas_src>
import functools
import math

import jax
import jax.numpy as jnp
import numpy as np
from jax.experimental import pallas as pl
from jax.experimental.pallas import tpu as pltpu

DECOMP = 24


# ---------------------------------------------------------------------------
# In-kernel helpers
# ---------------------------------------------------------------------------
def _series_decomp(y2, within_idx, L, k):
    """y2: (Bt*L, D) f32 holding Bt sequences of length L stacked along rows.

    Returns y2 - mean, where mean == avg_pool1d(y, k, stride=1, padding='SAME',
    exclusive=False) applied independently to each sequence.  Implemented as a
    banded rolling sum: ~k shifted + masked adds (O(k*L*D)) on the VPU instead of
    a dense (L, L) matmul (O(L^2*D)) on the MXU.
    """
    pad_left = (k - 1) // 2            # SAME padding, more on the right (TF/Paddle)
    acc = jnp.zeros_like(y2)
    for s in range(-pad_left, k - pad_left):
        lo, hi = max(0, -s), min(L, L - s)
        if lo >= hi:                   # this tap never lands inside a sequence
            continue
        # shifted[t] = y[t + s] along the flat row axis; rows whose window tap falls
        # outside their own sequence (or wraps) are masked to zero below.
        shifted = y2 if s == 0 else jnp.roll(y2, -s, axis=0)
        if lo == 0 and hi == L:
            acc = acc + shifted
        else:
            mask = (within_idx >= lo) & (within_idx < hi)
            acc = acc + jnp.where(mask, shifted, 0.0)
    return y2 - acc * (1.0 / k)        # exclusive=False => constant /k divisor


def _encoder_layer_kernel(src_ref,
                          wqkv_ref, bqkv_ref, wo_ref, bo_ref,
                          w1_ref, b1_ref, w2_ref, b2_ref,
                          out_ref, attn_scr, *, nhead, decomp_k):
    Bt, L, D = src_ref.shape
    Dh = D // nhead
    rows = Bt * L

    x3 = src_ref[...]                                    # (Bt, L, D) f32
    x2 = x3.reshape(rows, D)                             # stack sequences along sublanes
    x2_bf = x2.astype(jnp.bfloat16)

    # within-sequence position of every flat row (reused by both decomps)
    within_idx = jax.lax.broadcasted_iota(jnp.int32, (Bt, L, D), 1).reshape(rows, D)

    # ---- fused QKV projection: one MXU dot, Bt*L rows x 3D cols -------------
    qkv = jnp.dot(x2_bf, wqkv_ref[...],
                  preferred_element_type=jnp.float32) + bqkv_ref[...]     # (rows, 3D)
    q3 = qkv[:, 0 * D:1 * D].reshape(Bt, L, D)           # 1/sqrt(Dh) folded into Wq
    k3 = qkv[:, 1 * D:2 * D].reshape(Bt, L, D)
    v3 = qkv[:, 2 * D:3 * D].reshape(Bt, L, D)

    # ---- multi-head self-attention ------------------------------------------
    for h in range(nhead):                               # static unroll over heads
        sl = slice(h * Dh, (h + 1) * Dh)
        qh = q3[:, :, sl].astype(jnp.bfloat16)           # (Bt, L, Dh)
        kh = k3[:, :, sl].astype(jnp.bfloat16)
        vh = v3[:, :, sl].astype(jnp.bfloat16)
        s = jnp.einsum('bqd,bkd->bqk', qh, kh,
                       preferred_element_type=jnp.float32)                # (Bt, L, L)
        s = s - jnp.max(s, axis=-1, keepdims=True)
        p = jnp.exp(s)
        p = p * pl.reciprocal(jnp.sum(p, axis=-1, keepdims=True), approx=True)
        oh = jnp.einsum('bqk,bkd->bqd', p.astype(jnp.bfloat16), vh,
                        preferred_element_type=jnp.float32)               # (Bt, L, Dh)
        # write each head straight into the scratch accumulator (no concat)
        attn_scr[:, sl] = oh.reshape(rows, Dh)

    attn = jnp.dot(attn_scr[...].astype(jnp.bfloat16), wo_ref[...],
                   preferred_element_type=jnp.float32) + bo_ref[...]      # (rows, D)

    # residual + dropout1 (identity at eval), then SeriesDecomp
    x1 = _series_decomp(x2 + attn, within_idx, L, decomp_k)

    # ---- feed-forward ---------------------------------------------------------
    h1 = jnp.dot(x1.astype(jnp.bfloat16), w1_ref[...],
                 preferred_element_type=jnp.float32) + b1_ref[...]
    h1 = jnp.maximum(h1, 0.0)                            # relu; act dropout = identity
    h2 = jnp.dot(h1.astype(jnp.bfloat16), w2_ref[...],
                 preferred_element_type=jnp.float32) + b2_ref[...]

    # residual + dropout2 (identity at eval), then SeriesDecomp
    x_out = _series_decomp(x1 + h2, within_idx, L, decomp_k)
    out_ref[...] = x_out.reshape(Bt, L, D).astype(out_ref.dtype)
    # TODO(synk): training-mode dropout (upscale_in_train) not implemented; eval
    # semantics (identity) are reproduced exactly.
    # TODO(synk): for long sequences (L >= ~1024) the per-head (L, L) score tile
    # should be key-block tiled (flash-attention style) instead of materialized.


# ---------------------------------------------------------------------------
# Wrapper
# ---------------------------------------------------------------------------
def _full_spec(shape):
    return pl.BlockSpec(shape, lambda b: (0,) * len(shape))


def _pick_block_batch(B, L, target_rows=256):
    """Largest divisor Bt of B with Bt*L <= target_rows (fill MXU M-dim), while
    keeping >= 2 grid steps when B >= 2 so both v7x TensorCores get work."""
    cap = max(1, target_rows // max(L, 1))
    bt = 1
    for d in range(1, B + 1):
        if B % d == 0 and d <= cap:
            bt = d
    if B >= 2 and B // bt < 2:
        for d in range(bt, 0, -1):
            if B % d == 0 and B // d >= 2:
                bt = d
                break
    return bt


def _vmem_limit_bytes(Bt, L, D, F):
    bf16, f32 = 2, 4
    weights = (3 * D * D + D * D + 2 * D * F) * bf16 + (3 * D + 2 * D + F) * f32
    io_blocks = 2 * Bt * L * D * f32          # src block + out block
    scratch = Bt * L * D * f32
    est = 2 * (weights + io_blocks) + scratch + (8 << 20)   # x2: double-buffered pipeline
    return int(min(max(est, 32 << 20), 56 << 20))           # stay within v7x's 64 MiB


def transformer_encoder_layer(src, prepped, nhead, block_batch=None):
    B, L, D = src.shape
    F = prepped["w1"].shape[1]
    assert D % nhead == 0, "d_model must be divisible by nhead"
    Bt = _pick_block_batch(B, L) if block_batch is None else block_batch
    assert B % Bt == 0

    kernel = functools.partial(_encoder_layer_kernel, nhead=nhead, decomp_k=DECOMP)

    return pl.pallas_call(
        kernel,
        out_shape=jax.ShapeDtypeStruct((B, L, D), jnp.float32),
        grid_spec=pltpu.PrefetchScalarGridSpec(
            num_scalar_prefetch=0,
            grid=(B // Bt,),
            in_specs=[
                pl.BlockSpec((Bt, L, D), lambda b: (b, 0, 0)),   # src
                _full_spec((D, 3 * D)), _full_spec((1, 3 * D)),  # Wqkv (scale folded), bqkv
                _full_spec((D, D)), _full_spec((1, D)),          # Wo, bo
                _full_spec((D, F)), _full_spec((1, F)),          # W1, b1
                _full_spec((F, D)), _full_spec((1, D)),          # W2, b2
            ],
            out_specs=pl.BlockSpec((Bt, L, D), lambda b: (b, 0, 0)),
            scratch_shapes=[pltpu.VMEM((Bt * L, D), jnp.float32)],   # per-head attn accum
        ),
        compiler_params=pltpu.CompilerParams(
            dimension_semantics=("parallel",),
            vmem_limit_bytes=_vmem_limit_bytes(Bt, L, D, F),
        ),
    )(src,
      prepped["wqkv"], prepped["bqkv"], prepped["wo"], prepped["bo"],
      prepped["w1"], prepped["b1"], prepped["w2"], prepped["b2"])


# ---------------------------------------------------------------------------
# Params
# ---------------------------------------------------------------------------
def init_params(key, d_model, nhead, dims_feedforward):
    ks = jax.random.split(key, 12)
    g = lambda k, shape, s=0.1: jax.random.normal(k, shape, jnp.float32) * s
    return {
        "wq": g(ks[0], (d_model, d_model)), "bq": g(ks[1], (1, d_model), 0.01),
        "wk": g(ks[2], (d_model, d_model)), "bk": g(ks[3], (1, d_model), 0.01),
        "wv": g(ks[4], (d_model, d_model)), "bv": g(ks[5], (1, d_model), 0.01),
        "wo": g(ks[6], (d_model, d_model)), "bo": g(ks[7], (1, d_model), 0.01),
        "w1": g(ks[8], (d_model, dims_feedforward)),
        "b1": g(ks[9], (1, dims_feedforward), 0.01),
        "w2": g(ks[10], (dims_feedforward, d_model)),
        "b2": g(ks[11], (1, d_model), 0.01),
    }


def prepare_params(params, nhead):
    """Fuse Wq/Wk/Wv into one (D, 3D) weight, fold the 1/sqrt(Dh) attention scale
    into the Q projection, store weights in bf16 (biases stay f32: they are added
    to f32 accumulators)."""
    D = params["wq"].shape[0]
    scale = 1.0 / math.sqrt(D // nhead)
    wqkv = jnp.concatenate([params["wq"] * scale, params["wk"], params["wv"]], axis=1)
    bqkv = jnp.concatenate([params["bq"] * scale, params["bk"], params["bv"]], axis=1)
    return {
        "wqkv": wqkv.astype(jnp.bfloat16), "bqkv": bqkv.astype(jnp.float32),
        "wo": params["wo"].astype(jnp.bfloat16), "bo": params["bo"].astype(jnp.float32),
        "w1": params["w1"].astype(jnp.bfloat16), "b1": params["b1"].astype(jnp.float32),
        "w2": params["w2"].astype(jnp.bfloat16), "b2": params["b2"].astype(jnp.float32),
    }


# ---------------------------------------------------------------------------
# Pure-JAX reference (same eval-mode semantics, f32 math on the bf16 weights)
# ---------------------------------------------------------------------------
def _same_avgpool_matrix(L, kernel_size):
    """(L, L) matrix M with M @ x == avg_pool1d(x, k, stride=1, SAME, exclusive=False).
    Used only by the reference below (the kernel uses a banded rolling sum)."""
    pad_left = (kernel_size - 1) // 2
    A = np.zeros((L, L), dtype=np.float32)
    for t in range(L):
        for j in range(t - pad_left, t - pad_left + kernel_size):
            if 0 <= j < L:
                A[t, j] = 1.0 / kernel_size
    return jnp.asarray(A)


def reference_forward(src, prepped, nhead, decomp_k=DECOMP):
    B, L, D = src.shape
    Dh = D // nhead
    f32 = lambda a: a.astype(jnp.float32)
    A = _same_avgpool_matrix(L, decomp_k)
    decomp = lambda x: x - jnp.einsum('tl,bld->btd', A, x)

    qkv = src @ f32(prepped["wqkv"]) + prepped["bqkv"]
    q, k, v = jnp.split(qkv, 3, axis=-1)
    split = lambda a: a.reshape(B, L, nhead, Dh).transpose(0, 2, 1, 3)
    qh, kh, vh = split(q), split(k), split(v)
    s = jnp.einsum('bhqd,bhkd->bhqk', qh, kh)            # scale already folded into Wq
    p = jax.nn.softmax(s, axis=-1)
    ctx = jnp.einsum('bhqk,bhkd->bhqd', p, vh).transpose(0, 2, 1, 3).reshape(B, L, D)
    attn = ctx @ f32(prepped["wo"]) + prepped["bo"]

    x1 = decomp(src + attn)
    h1 = jnp.maximum(x1 @ f32(prepped["w1"]) + prepped["b1"], 0.0)
    h2 = h1 @ f32(prepped["w2"]) + prepped["b2"]
    return decomp(x1 + h2)


if __name__ == "__main__":
    B, L, d_model, nhead, ffw = 2, 8, 32, 4, 64

    key = jax.random.PRNGKey(0)
    k_src, k_par = jax.random.split(key)
    src = jax.random.normal(k_src, (B, L, d_model), jnp.float32)
    prepped = prepare_params(init_params(k_par, d_model, nhead, ffw), nhead)

    out = jax.block_until_ready(transformer_encoder_layer(src, prepped, nhead))

    assert out.shape == (B, L, d_model)
    assert bool(jnp.all(jnp.isfinite(out)))
    ref = reference_forward(src, prepped, nhead)
    assert bool(jnp.allclose(out, ref, atol=5e-2, rtol=5e-2)), \
        float(jnp.max(jnp.abs(out - ref)))
    print("KERNEL_OK")
</pallas_src>

<mosaic_0001>
module attributes {stable_mosaic.version = 11 : i64} {
  func.func @_encoder_layer_kernel(%arg0: i32, %arg1: memref<1x8x32xf32, #tpu.memory_space<vmem>>, %arg2: memref<32x96xbf16, #tpu.memory_space<vmem>>, %arg3: memref<1x96xf32, #tpu.memory_space<vmem>>, %arg4: memref<32x32xbf16, #tpu.memory_space<vmem>>, %arg5: memref<1x32xf32, #tpu.memory_space<vmem>>, %arg6: memref<32x64xbf16, #tpu.memory_space<vmem>>, %arg7: memref<1x64xf32, #tpu.memory_space<vmem>>, %arg8: memref<64x32xbf16, #tpu.memory_space<vmem>>, %arg9: memref<1x32xf32, #tpu.memory_space<vmem>>, %arg10: memref<1x8x32xf32, #tpu.memory_space<vmem>>, %arg11: memref<8x32xf32, #tpu.memory_space<vmem>>) attributes {dimension_semantics = [#tpu.dimension_semantics<parallel>], iteration_bounds = array<i64: 2>, scalar_prefetch = 0 : i64, scratch_operands = 1 : i64, tpu.core_type = #tpu.core_type<tc>, window_params = [{transform_indices = @transform_0, window_bounds = array<i64: 1, 8, 32>}, {pipeline_mode = #tpu.pipeline_mode<synchronous>, transform_indices = @transform_1, window_bounds = array<i64: 32, 96>}, {pipeline_mode = #tpu.pipeline_mode<synchronous>, transform_indices = @transform_2, window_bounds = array<i64: 1, 96>}, {pipeline_mode = #tpu.pipeline_mode<synchronous>, transform_indices = @transform_3, window_bounds = array<i64: 32, 32>}, {pipeline_mode = #tpu.pipeline_mode<synchronous>, transform_indices = @transform_4, window_bounds = array<i64: 1, 32>}, {pipeline_mode = #tpu.pipeline_mode<synchronous>, transform_indices = @transform_5, window_bounds = array<i64: 32, 64>}, {pipeline_mode = #tpu.pipeline_mode<synchronous>, transform_indices = @transform_6, window_bounds = array<i64: 1, 64>}, {pipeline_mode = #tpu.pipeline_mode<synchronous>, transform_indices = @transform_7, window_bounds = array<i64: 64, 32>}, {pipeline_mode = #tpu.pipeline_mode<synchronous>, transform_indices = @transform_8, window_bounds = array<i64: 1, 32>}, {transform_indices = @transform_9, window_bounds = array<i64: 1, 8, 32>}]} {
    %c0 = arith.constant 0 : index
    %c0_0 = arith.constant 0 : index
    %c0_1 = arith.constant 0 : index
    %0 = vector.load %arg1[%c0, %c0_0, %c0_1] : memref<1x8x32xf32, #tpu.memory_space<vmem>>, vector<1x8x32xf32>
    %1 = vector.shape_cast %0 : vector<1x8x32xf32> to vector<8x32xf32>
    %2 = arith.truncf %1 : vector<8x32xf32> to vector<8x32xbf16>
    %3 = tpu.iota {dimensions = array<i32: 1>} : vector<1x8x32xi32>
    %4 = vector.shape_cast %3 : vector<1x8x32xi32> to vector<8x32xi32>
    %c0_2 = arith.constant 0 : index
    %c0_3 = arith.constant 0 : index
    %5 = vector.load %arg2[%c0_2, %c0_3] : memref<32x96xbf16, #tpu.memory_space<vmem>>, vector<32x96xbf16>
    %cst = arith.constant dense<0.000000e+00> : vector<8x96xf32>
    %6 = tpu.matmul %2, %5, %cst {dimension_numbers = #tpu.dot_dimension_numbers<[1], [0], [0], [1], [0, 0, 1, 1], [], []>} : vector<8x32xbf16>, vector<32x96xbf16>, vector<8x96xf32> -> vector<8x96xf32>
    %c0_4 = arith.constant 0 : index
    %c0_5 = arith.constant 0 : index
    %7 = vector.load %arg3[%c0_4, %c0_5] : memref<1x96xf32, #tpu.memory_space<vmem>>, vector<1x96xf32>
    %8 = vector.broadcast %7 : vector<1x96xf32> to vector<8x96xf32>
    %9 = arith.addf %6, %8 : vector<8x96xf32>
    %10 = vector.extract_strided_slice %9 {offsets = [0, 0], sizes = [8, 32], strides = [1, 1]} : vector<8x96xf32> to vector<8x32xf32>
    %11 = vector.shape_cast %10 : vector<8x32xf32> to vector<1x8x32xf32>
    %12 = vector.extract_strided_slice %9 {offsets = [0, 32], sizes = [8, 32], strides = [1, 1]} : vector<8x96xf32> to vector<8x32xf32>
    %13 = vector.shape_cast %12 : vector<8x32xf32> to vector<1x8x32xf32>
    %14 = vector.extract_strided_slice %9 {offsets = [0, 64], sizes = [8, 32], strides = [1, 1]} : vector<8x96xf32> to vector<8x32xf32>
    %15 = vector.shape_cast %14 : vector<8x32xf32> to vector<1x8x32xf32>
    %16 = vector.extract_strided_slice %11 {offsets = [0, 0, 0], sizes = [1, 8, 8], strides = [1, 1, 1]} : vector<1x8x32xf32> to vector<1x8x8xf32>
    %17 = arith.truncf %16 : vector<1x8x8xf32> to vector<1x8x8xbf16>
    %18 = vector.extract_strided_slice %13 {offsets = [0, 0, 0], sizes = [1, 8, 8], strides = [1, 1, 1]} : vector<1x8x32xf32> to vector<1x8x8xf32>
    %19 = arith.truncf %18 : vector<1x8x8xf32> to vector<1x8x8xbf16>
    %20 = vector.extract_strided_slice %15 {offsets = [0, 0, 0], sizes = [1, 8, 8], strides = [1, 1, 1]} : vector<1x8x32xf32> to vector<1x8x8xf32>
    %21 = arith.truncf %20 : vector<1x8x8xf32> to vector<1x8x8xbf16>
    "tpu.trace_start"() <{level = 10 : i32, message = "bqd,bkd->bqk"}> : () -> ()
    %cst_6 = arith.constant dense<0.000000e+00> : vector<1x8x8xf32>
    %22 = tpu.matmul %17, %19, %cst_6 {dimension_numbers = #tpu.dot_dimension_numbers<[2], [2], [1], [1], [0, 0, 0, 1, 1, 1], [0], [0]>} : vector<1x8x8xbf16>, vector<1x8x8xbf16>, vector<1x8x8xf32> -> vector<1x8x8xf32>
    "tpu.trace_stop"() : () -> ()
    %cst_7 = arith.constant dense<0xFF800000> : vector<1x8xf32>
    %23 = vector.multi_reduction <maximumf>, %22, %cst_7 [2] : vector<1x8x8xf32> to vector<1x8xf32>
    %24 = vector.shape_cast %23 : vector<1x8xf32> to vector<1x8x1xf32>
    %25 = vector.broadcast %24 : vector<1x8x1xf32> to vector<1x8x8xf32>
    %26 = arith.subf %22, %25 : vector<1x8x8xf32>
    %27 = math.exp %26 : vector<1x8x8xf32>
    %cst_8 = arith.constant dense<0.000000e+00> : vector<1x8xf32>
    %28 = vector.multi_reduction <add>, %27, %cst_8 [2] : vector<1x8x8xf32> to vector<1x8xf32>
    %29 = vector.shape_cast %28 : vector<1x8xf32> to vector<1x8x1xf32>
    %30 = tpu.reciprocal %29 {approx = true} : vector<1x8x1xf32> -> vector<1x8x1xf32>
    %31 = vector.broadcast %30 : vector<1x8x1xf32> to vector<1x8x8xf32>
    %32 = arith.mulf %27, %31 : vector<1x8x8xf32>
    %33 = arith.truncf %32 : vector<1x8x8xf32> to vector<1x8x8xbf16>
    "tpu.trace_start"() <{level = 10 : i32, message = "bqk,bkd->bqd"}> : () -> ()
    %cst_9 = arith.constant dense<0.000000e+00> : vector<1x8x8xf32>
    %34 = tpu.matmul %33, %21, %cst_9 {dimension_numbers = #tpu.dot_dimension_numbers<[2], [1], [1], [2], [0, 0, 0, 1, 1, 2], [0], [0]>} : vector<1x8x8xbf16>, vector<1x8x8xbf16>, vector<1x8x8xf32> -> vector<1x8x8xf32>
    "tpu.trace_stop"() : () -> ()
    %35 = vector.shape_cast %34 : vector<1x8x8xf32> to vector<8x8xf32>
    %c0_10 = arith.constant 0 : index
    %c0_11 = arith.constant 0 : index
    %36 = vector.load %arg11[%c0_10, %c0_11] : memref<8x32xf32, #tpu.memory_space<vmem>>, vector<8x8xf32>
    tpu.vector_store %arg11[%c0_10, %c0_11], %35 {strides = array<i32>} : memref<8x32xf32, #tpu.memory_space<vmem>>, vector<8x8xf32>,
    %37 = vector.extract_strided_slice %11 {offsets = [0, 0, 8], sizes = [1, 8, 8], strides = [1, 1, 1]} : vector<1x8x32xf32> to vector<1x8x8xf32>
    %38 = arith.truncf %37 : vector<1x8x8xf32> to vector<1x8x8xbf16>
    %39 = vector.extract_strided_slice %13 {offsets = [0, 0, 8], sizes = [1, 8, 8], strides = [1, 1, 1]} : vector<1x8x32xf32> to vector<1x8x8xf32>
    %40 = arith.truncf %39 : vector<1x8x8xf32> to vector<1x8x8xbf16>
    %41 = vector.extract_strided_slice %15 {offsets = [0, 0, 8], sizes = [1, 8, 8], strides = [1, 1, 1]} : vector<1x8x32xf32> to vector<1x8x8xf32>
    %42 = arith.truncf %41 : vector<1x8x8xf32> to vector<1x8x8xbf16>
    "tpu.trace_start"() <{level = 10 : i32, message = "bqd,bkd->bqk"}> : () -> ()
    %cst_12 = arith.constant dense<0.000000e+00> : vector<1x8x8xf32>
    %43 = tpu.matmul %38, %40, %cst_12 {dimension_numbers = #tpu.dot_dimension_numbers<[2], [2], [1], [1], [0, 0, 0, 1, 1, 1], [0], [0]>} : vector<1x8x8xbf16>, vector<1x8x8xbf16>, vector<1x8x8xf32> -> vector<1x8x8xf32>
    "tpu.trace_stop"() : () -> ()
    %cst_13 = arith.constant dense<0xFF800000> : vector<1x8xf32>
    %44 = vector.multi_reduction <maximumf>, %43, %cst_13 [2] : vector<1x8x8xf32> to vector<1x8xf32>
    %45 = vector.shape_cast %44 : vector<1x8xf32> to vector<1x8x1xf32>
    %46 = vector.broadcast %45 : vector<1x8x1xf32> to vector<1x8x8xf32>
    %47 = arith.subf %43, %46 : vector<1x8x8xf32>
    %48 = math.exp %47 : vector<1x8x8xf32>
    %cst_14 = arith.constant dense<0.000000e+00> : vector<1x8xf32>
    %49 = vector.multi_reduction <add>, %48, %cst_14 [2] : vector<1x8x8xf32> to vector<1x8xf32>
    %50 = vector.shape_cast %49 : vector<1x8xf32> to vector<1x8x1xf32>
    %51 = tpu.reciprocal %50 {approx = true} : vector<1x8x1xf32> -> vector<1x8x1xf32>
    %52 = vector.broadcast %51 : vector<1x8x1xf32> to vector<1x8x8xf32>
    %53 = arith.mulf %48, %52 : vector<1x8x8xf32>
    %54 = arith.truncf %53 : vector<1x8x8xf32> to vector<1x8x8xbf16>
    "tpu.trace_start"() <{level = 10 : i32, message = "bqk,bkd->bqd"}> : () -> ()
    %cst_15 = arith.constant dense<0.000000e+00> : vector<1x8x8xf32>
    %55 = tpu.matmul %54, %42, %cst_15 {dimension_numbers = #tpu.dot_dimension_numbers<[2], [1], [1], [2], [0, 0, 0, 1, 1, 2], [0], [0]>} : vector<1x8x8xbf16>, vector<1x8x8xbf16>, vector<1x8x8xf32> -> vector<1x8x8xf32>
    "tpu.trace_stop"() : () -> ()
    %56 = vector.shape_cast %55 : vector<1x8x8xf32> to vector<8x8xf32>
    %c0_16 = arith.constant 0 : index
    %c8 = arith.constant 8 : index
    %57 = vector.load %arg11[%c0_16, %c8] : memref<8x32xf32, #tpu.memory_space<vmem>>, vector<8x8xf32>
    tpu.vector_store %arg11[%c0_16, %c8], %56 {strides = array<i32>} : memref<8x32xf32, #tpu.memory_space<vmem>>, vector<8x8xf32>,
    %58 = vector.extract_strided_slice %11 {offsets = [0, 0, 16], sizes = [1, 8, 8], strides = [1, 1, 1]} : vector<1x8x32xf32> to vector<1x8x8xf32>
    %59 = arith.truncf %58 : vector<1x8x8xf32> to vector<1x8x8xbf16>
    %60 = vector.extract_strided_slice %13 {offsets = [0, 0, 16], sizes = [1, 8, 8], strides = [1, 1, 1]} : vector<1x8x32xf32> to vector<1x8x8xf32>
    %61 = arith.truncf %60 : vector<1x8x8xf32> to vector<1x8x8xbf16>
    %62 = vector.extract_strided_slice %15 {offsets = [0, 0, 16], sizes = [1, 8, 8], strides = [1, 1, 1]} : vector<1x8x32xf32> to vector<1x8x8xf32>
    %63 = arith.truncf %62 : vector<1x8x8xf32> to vector<1x8x8xbf16>
    "tpu.trace_start"() <{level = 10 : i32, message = "bqd,bkd->bqk"}> : () -> ()
    %cst_17 = arith.constant dense<0.000000e+00> : vector<1x8x8xf32>
    %64 = tpu.matmul %59, %61, %cst_17 {dimension_numbers = #tpu.dot_dimension_numbers<[2], [2], [1], [1], [0, 0, 0, 1, 1, 1], [0], [0]>} : vector<1x8x8xbf16>, vector<1x8x8xbf16>, vector<1x8x8xf32> -> vector<1x8x8xf32>
    "tpu.trace_stop"() : () -> ()
    %cst_18 = arith.constant dense<0xFF800000> : vector<1x8xf32>
    %65 = vector.multi_reduction <maximumf>, %64, %cst_18 [2] : vector<1x8x8xf32> to vector<1x8xf32>
    %66 = vector.shape_cast %65 : vector<1x8xf32> to vector<1x8x1xf32>
    %67 = vector.broadcast %66 : vector<1x8x1xf32> to vector<1x8x8xf32>
    %68 = arith.subf %64, %67 : vector<1x8x8xf32>
    %69 = math.exp %68 : vector<1x8x8xf32>
    %cst_19 = arith.constant dense<0.000000e+00> : vector<1x8xf32>
    %70 = vector.multi_reduction <add>, %69, %cst_19 [2] : vector<1x8x8xf32> to vector<1x8xf32>
    %71 = vector.shape_cast %70 : vector<1x8xf32> to vector<1x8x1xf32>
    %72 = tpu.reciprocal %71 {approx = true} : vector<1x8x1xf32> -> vector<1x8x1xf32>
    %73 = vector.broadcast %72 : vector<1x8x1xf32> to vector<1x8x8xf32>
    %74 = arith.mulf %69, %73 : vector<1x8x8xf32>
    %75 = arith.truncf %74 : vector<1x8x8xf32> to vector<1x8x8xbf16>
    "tpu.trace_start"() <{level = 10 : i32, message = "bqk,bkd->bqd"}> : () -> ()
    %cst_20 = arith.constant dense<0.000000e+00> : vector<1x8x8xf32>
    %76 = tpu.matmul %75, %63, %cst_20 {dimension_numbers = #tpu.dot_dimension_numbers<[2], [1], [1], [2], [0, 0, 0, 1, 1, 2], [0], [0]>} : vector<1x8x8xbf16>, vector<1x8x8xbf16>, vector<1x8x8xf32> -> vector<1x8x8xf32>
    "tpu.trace_stop"() : () -> ()
    %77 = vector.shape_cast %76 : vector<1x8x8xf32> to vector<8x8xf32>
    %c0_21 = arith.constant 0 : index
    %c16 = arith.constant 16 : index
    %78 = vector.load %arg11[%c0_21, %c16] : memref<8x32xf32, #tpu.memory_space<vmem>>, vector<8x8xf32>
    tpu.vector_store %arg11[%c0_21, %c16], %77 {strides = array<i32>} : memref<8x32xf32, #tpu.memory_space<vmem>>, vector<8x8xf32>,
    %79 = vector.extract_strided_slice %11 {offsets = [0, 0, 24], sizes = [1, 8, 8], strides = [1, 1, 1]} : vector<1x8x32xf32> to vector<1x8x8xf32>
    %80 = arith.truncf %79 : vector<1x8x8xf32> to vector<1x8x8xbf16>
    %81 = vector.extract_strided_slice %13 {offsets = [0, 0, 24], sizes = [1, 8, 8], strides = [1, 1, 1]} : vector<1x8x32xf32> to vector<1x8x8xf32>
    %82 = arith.truncf %81 : vector<1x8x8xf32> to vector<1x8x8xbf16>
    %83 = vector.extract_strided_slice %15 {offsets = [0, 0, 24], sizes = [1, 8, 8], strides = [1, 1, 1]} : vector<1x8x32xf32> to vector<1x8x8xf32>
    %84 = arith.truncf %83 : vector<1x8x8xf32> to vector<1x8x8xbf16>
    "tpu.trace_start"() <{level = 10 : i32, message = "bqd,bkd->bqk"}> : () -> ()
    %cst_22 = arith.constant dense<0.000000e+00> : vector<1x8x8xf32>
    %85 = tpu.matmul %80, %82, %cst_22 {dimension_numbers = #tpu.dot_dimension_numbers<[2], [2], [1], [1], [0, 0, 0, 1, 1, 1], [0], [0]>} : vector<1x8x8xbf16>, vector<1x8x8xbf16>, vector<1x8x8xf32> -> vector<1x8x8xf32>
    "tpu.trace_stop"() : () -> ()
    %cst_23 = arith.constant dense<0xFF800000> : vector<1x8xf32>
    %86 = vector.multi_reduction <maximumf>, %85, %cst_23 [2] : vector<1x8x8xf32> to vector<1x8xf32>
    %87 = vector.shape_cast %86 : vector<1x8xf32> to vector<1x8x1xf32>
    %88 = vector.broadcast %87 : vector<1x8x1xf32> to vector<1x8x8xf32>
    %89 = arith.subf %85, %88 : vector<1x8x8xf32>
    %90 = math.exp %89 : vector<1x8x8xf32>
    %cst_24 = arith.constant dense<0.000000e+00> : vector<1x8xf32>
    %91 = vector.multi_reduction <add>, %90, %cst_24 [2] : vector<1x8x8xf32> to vector<1x8xf32>
    %92 = vector.shape_cast %91 : vector<1x8xf32> to vector<1x8x1xf32>
    %93 = tpu.reciprocal %92 {approx = true} : vector<1x8x1xf32> -> vector<1x8x1xf32>
    %94 = vector.broadcast %93 : vector<1x8x1xf32> to vector<1x8x8xf32>
    %95 = arith.mulf %90, %94 : vector<1x8x8xf32>
    %96 = arith.truncf %95 : vector<1x8x8xf32> to vector<1x8x8xbf16>
    "tpu.trace_start"() <{level = 10 : i32, message = "bqk,bkd->bqd"}> : () -> ()
    %cst_25 = arith.constant dense<0.000000e+00> : vector<1x8x8xf32>
    %97 = tpu.matmul %96, %84, %cst_25 {dimension_numbers = #tpu.dot_dimension_numbers<[2], [1], [1], [2], [0, 0, 0, 1, 1, 2], [0], [0]>} : vector<1x8x8xbf16>, vector<1x8x8xbf16>, vector<1x8x8xf32> -> vector<1x8x8xf32>
    "tpu.trace_stop"() : () -> ()
    %98 = vector.shape_cast %97 : vector<1x8x8xf32> to vector<8x8xf32>
    %c0_26 = arith.constant 0 : index
    %c24 = arith.constant 24 : index
    %99 = vector.load %arg11[%c0_26, %c24] : memref<8x32xf32, #tpu.memory_space<vmem>>, vector<8x8xf32>
    tpu.vector_store %arg11[%c0_26, %c24], %98 {strides = array<i32>} : memref<8x32xf32, #tpu.memory_space<vmem>>, vector<8x8xf32>,
    %c0_27 = arith.constant 0 : index
    %c0_28 = arith.constant 0 : index
    %100 = vector.load %arg11[%c0_27, %c0_28] : memref<8x32xf32, #tpu.memory_space<vmem>>, vector<8x32xf32>
    %101 = arith.truncf %100 : vector<8x32xf32> to vector<8x32xbf16>
    %c0_29 = arith.constant 0 : index
    %c0_30 = arith.constant 0 : index
    %102 = vector.load %arg4[%c0_29, %c0_30] : memref<32x32xbf16, #tpu.memory_space<vmem>>, vector<32x32xbf16>
    %cst_31 = arith.constant dense<0.000000e+00> : vector<8x32xf32>
    %103 = tpu.matmul %101, %102, %cst_31 {dimension_numbers = #tpu.dot_dimension_numbers<[1], [0], [0], [1], [0, 0, 1, 1], [], []>} : vector<8x32xbf16>, vector<32x32xbf16>, vector<8x32xf32> -> vector<8x32xf32>
    %c0_32 = arith.constant 0 : index
    %c0_33 = arith.constant 0 : index
    %104 = vector.load %arg5[%c0_32, %c0_33] : memref<1x32xf32, #tpu.memory_space<vmem>>, vector<1x32xf32>
    %105 = vector.broadcast %104 : vector<1x32xf32> to vector<8x32xf32>
    %106 = arith.addf %103, %105 : vector<8x32xf32>
    %107 = arith.addf %1, %106 : vector<8x32xf32>
    %cst_34 = arith.constant 0.000000e+00 : f32
    %108 = vector.broadcast %cst_34 : f32 to vector<8x32xf32>
    %109 = vector.extract_strided_slice %107 {offsets = [1, 0], sizes = [7, 32], strides = [1, 1]} : vector<8x32xf32> to vector<7x32xf32>
    %110 = vector.extract_strided_slice %107 {offsets = [0, 0], sizes = [1, 32], strides = [1, 1]} : vector<8x32xf32> to vector<1x32xf32>
    %111 = tpu.concatenate %109, %110 in 0 : vector<7x32xf32>, vector<1x32xf32> -> vector<8x32xf32>
    %c7_i32 = arith.constant 7 : i32
    %112 = vector.broadcast %c7_i32 : i32 to vector<8x32xi32>
    %113 = arith.cmpi sge, %4, %112 : vector<8x32xi32>
    %c8_i32 = arith.constant 8 : i32
    %114 = vector.broadcast %c8_i32 : i32 to vector<8x32xi32>
    %115 = arith.cmpi slt, %4, %114 : vector<8x32xi32>
    %116 = arith.andi %113, %115 : vector<8x32xi1>
    %cst_35 = arith.constant 0.000000e+00 : f32
    %117 = vector.broadcast %cst_35 : f32 to vector<8x32xf32>
    %118 = arith.select %116, %111, %117 : vector<8x32xi1>, vector<8x32xf32>
    %119 = arith.addf %108, %118 : vector<8x32xf32>
    %120 = vector.extract_strided_slice %107 {offsets = [2, 0], sizes = [6, 32], strides = [1, 1]} : vector<8x32xf32> to vector<6x32xf32>
    %121 = vector.extract_strided_slice %107 {offsets = [0, 0], sizes = [2, 32], strides = [1, 1]} : vector<8x32xf32> to vector<2x32xf32>
    %122 = tpu.concatenate %120, %121 in 0 : vector<6x32xf32>, vector<2x32xf32> -> vector<8x32xf32>
    %c6_i32 = arith.constant 6 : i32
    %123 = vector.broadcast %c6_i32 : i32 to vector<8x32xi32>
    %124 = arith.cmpi sge, %4, %123 : vector<8x32xi32>
    %c8_i32_36 = arith.constant 8 : i32
    %125 = vector.broadcast %c8_i32_36 : i32 to vector<8x32xi32>
    %126 = arith.cmpi slt, %4, %125 : vector<8x32xi32>
    %127 = arith.andi %124, %126 : vector<8x32xi1>
    %cst_37 = arith.constant 0.000000e+00 : f32
    %128 = vector.broadcast %cst_37 : f32 to vector<8x32xf32>
    %129 = arith.select %127, %122, %128 : vector<8x32xi1>, vector<8x32xf32>
    %130 = arith.addf %119, %129 : vector<8x32xf32>
    %131 = vector.extract_strided_slice %107 {offsets = [3, 0], sizes = [5, 32], strides = [1, 1]} : vector<8x32xf32> to vector<5x32xf32>
    %132 = vector.extract_strided_slice %107 {offsets = [0, 0], sizes = [3, 32], strides = [1, 1]} : vector<8x32xf32> to vector<3x32xf32>
    %133 = tpu.concatenate %131, %132 in 0 : vector<5x32xf32>, vector<3x32xf32> -> vector<8x32xf32>
    %c5_i32 = arith.constant 5 : i32
    %134 = vector.broadcast %c5_i32 : i32 to vector<8x32xi32>
    %135 = arith.cmpi sge, %4, %134 : vector<8x32xi32>
    %c8_i32_38 = arith.constant 8 : i32
    %136 = vector.broadcast %c8_i32_38 : i32 to vector<8x32xi32>
    %137 = arith.cmpi slt, %4, %136 : vector<8x32xi32>
    %138 = arith.andi %135, %137 : vector<8x32xi1>
    %cst_39 = arith.constant 0.000000e+00 : f32
    %139 = vector.broadcast %cst_39 : f32 to vector<8x32xf32>
    %140 = arith.select %138, %133, %139 : vector<8x32xi1>, vector<8x32xf32>
    %141 = arith.addf %130, %140 : vector<8x32xf32>
    %142 = vector.extract_strided_slice %107 {offsets = [4, 0], sizes = [4, 32], strides = [1, 1]} : vector<8x32xf32> to vector<4x32xf32>
    %143 = vector.extract_strided_slice %107 {offsets = [0, 0], sizes = [4, 32], strides = [1, 1]} : vector<8x32xf32> to vector<4x32xf32>
    %144 = tpu.concatenate %142, %143 in 0 : vector<4x32xf32>, vector<4x32xf32> -> vector<8x32xf32>
    %c4_i32 = arith.constant 4 : i32
    %145 = vector.broadcast %c4_i32 : i32 to vector<8x32xi32>
    %146 = arith.cmpi sge, %4, %145 : vector<8x32xi32>
    %c8_i32_40 = arith.constant 8 : i32
    %147 = vector.broadcast %c8_i32_40 : i32 to vector<8x32xi32>
    %148 = arith.cmpi slt, %4, %147 : vector<8x32xi32>
    %149 = arith.andi %146, %148 : vector<8x32xi1>
    %cst_41 = arith.constant 0.000000e+00 : f32
    %150 = vector.broadcast %cst_41 : f32 to vector<8x32xf32>
    %151 = arith.select %149, %144, %150 : vector<8x32xi1>, vector<8x32xf32>
    %152 = arith.addf %141, %151 : vector<8x32xf32>
    %153 = vector.extract_strided_slice %107 {offsets = [5, 0], sizes = [3, 32], strides = [1, 1]} : vector<8x32xf32> to vector<3x32xf32>
    %154 = vector.extract_strided_slice %107 {offsets = [0, 0], sizes = [5, 32], strides = [1, 1]} : vector<8x32xf32> to vector<5x32xf32>
    %155 = tpu.concatenate %153, %154 in 0 : vector<3x32xf32>, vector<5x32xf32> -> vector<8x32xf32>
    %c3_i32 = arith.constant 3 : i32
    %156 = vector.broadcast %c3_i32 : i32 to vector<8x32xi32>
    %157 = arith.cmpi sge, %4, %156 : vector<8x32xi32>
    %c8_i32_42 = arith.constant 8 : i32
    %158 = vector.broadcast %c8_i32_42 : i32 to vector<8x32xi32>
    %159 = arith.cmpi slt, %4, %158 : vector<8x32xi32>
    %160 = arith.andi %157, %159 : vector<8x32xi1>
    %cst_43 = arith.constant 0.000000e+00 : f32
    %161 = vector.broadcast %cst_43 : f32 to vector<8x32xf32>
    %162 = arith.select %160, %155, %161 : vector<8x32xi1>, vector<8x32xf32>
    %163 = arith.addf %152, %162 : vector<8x32xf32>
    %164 = vector.extract_strided_slice %107 {offsets = [6, 0], sizes = [2, 32], strides = [1, 1]} : vector<8x32xf32> to vector<2x32xf32>
    %165 = vector.extract_strided_slice %107 {offsets = [0, 0], sizes = [6, 32], strides = [1, 1]} : vector<8x32xf32> to vector<6x32xf32>
    %166 = tpu.concatenate %164, %165 in 0 : vector<2x32xf32>, vector<6x32xf32> -> vector<8x32xf32>
    %c2_i32 = arith.constant 2 : i32
    %167 = vector.broadcast %c2_i32 : i32 to vector<8x32xi32>
    %168 = arith.cmpi sge, %4, %167 : vector<8x32xi32>
    %c8_i32_44 = arith.constant 8 : i32
    %169 = vector.broadcast %c8_i32_44 : i32 to vector<8x32xi32>
    %170 = arith.cmpi slt, %4, %169 : vector<8x32xi32>
    %171 = arith.andi %168, %170 : vector<8x32xi1>
    %cst_45 = arith.constant 0.000000e+00 : f32
    %172 = vector.broadcast %cst_45 : f32 to vector<8x32xf32>
    %173 = arith.select %171, %166, %172 : vector<8x32xi1>, vector<8x32xf32>
    %174 = arith.addf %163, %173 : vector<8x32xf32>
    %175 = vector.extract_strided_slice %107 {offsets = [7, 0], sizes = [1, 32], strides = [1, 1]} : vector<8x32xf32> to vector<1x32xf32>
    %176 = vector.extract_strided_slice %107 {offsets = [0, 0], sizes = [7, 32], strides = [1, 1]} : vector<8x32xf32> to vector<7x32xf32>
    %177 = tpu.concatenate %175, %176 in 0 : vector<1x32xf32>, vector<7x32xf32> -> vector<8x32xf32>
    %c1_i32 = arith.constant 1 : i32
    %178 = vector.broadcast %c1_i32 : i32 to vector<8x32xi32>
    %179 = arith.cmpi sge, %4, %178 : vector<8x32xi32>
    %c8_i32_46 = arith.constant 8 : i32
    %180 = vector.broadcast %c8_i32_46 : i32 to vector<8x32xi32>
    %181 = arith.cmpi slt, %4, %180 : vector<8x32xi32>
    %182 = arith.andi %179, %181 : vector<8x32xi1>
    %cst_47 = arith.constant 0.000000e+00 : f32
    %183 = vector.broadcast %cst_47 : f32 to vector<8x32xf32>
    %184 = arith.select %182, %177, %183 : vector<8x32xi1>, vector<8x32xf32>
    %185 = arith.addf %174, %184 : vector<8x32xf32>
    %186 = arith.addf %185, %107 : vector<8x32xf32>
    %187 = vector.extract_strided_slice %107 {offsets = [1, 0], sizes = [7, 32], strides = [1, 1]} : vector<8x32xf32> to vector<7x32xf32>
    %188 = vector.extract_strided_slice %107 {offsets = [0, 0], sizes = [1, 32], strides = [1, 1]} : vector<8x32xf32> to vector<1x32xf32>
    %189 = tpu.concatenate %187, %188 in 0 : vector<7x32xf32>, vector<1x32xf32> -> vector<8x32xf32>
    %c0_i32 = arith.constant 0 : i32
    %190 = vector.broadcast %c0_i32 : i32 to vector<8x32xi32>
    %191 = arith.cmpi sge, %4, %190 : vector<8x32xi32>
    %c7_i32_48 = arith.constant 7 : i32
    %192 = vector.broadcast %c7_i32_48 : i32 to vector<8x32xi32>
    %193 = arith.cmpi slt, %4, %192 : vector<8x32xi32>
    %194 = arith.andi %191, %193 : vector<8x32xi1>
    %cst_49 = arith.constant 0.000000e+00 : f32
    %195 = vector.broadcast %cst_49 : f32 to vector<8x32xf32>
    %196 = arith.select %194, %189, %195 : vector<8x32xi1>, vector<8x32xf32>
    %197 = arith.addf %186, %196 : vector<8x32xf32>
    %198 = vector.extract_strided_slice %107 {offsets = [2, 0], sizes = [6, 32], strides = [1, 1]} : vector<8x32xf32> to vector<6x32xf32>
    %199 = vector.extract_strided_slice %107 {offsets = [0, 0], sizes = [2, 32], strides = [1, 1]} : vector<8x32xf32> to vector<2x32xf32>
    %200 = tpu.concatenate %198, %199 in 0 : vector<6x32xf32>, vector<2x32xf32> -> vector<8x32xf32>
    %c0_i32_50 = arith.constant 0 : i32
    %201 = vector.broadcast %c0_i32_50 : i32 to vector<8x32xi32>
    %202 = arith.cmpi sge, %4, %201 : vector<8x32xi32>
    %c6_i32_51 = arith.constant 6 : i32
    %203 = vector.broadcast %c6_i32_51 : i32 to vector<8x32xi32>
    %204 = arith.cmpi slt, %4, %203 : vector<8x32xi32>
    %205 = arith.andi %202, %204 : vector<8x32xi1>
    %cst_52 = arith.constant 0.000000e+00 : f32
    %206 = vector.broadcast %cst_52 : f32 to vector<8x32xf32>
    %207 = arith.select %205, %200, %206 : vector<8x32xi1>, vector<8x32xf32>
    %208 = arith.addf %197, %207 : vector<8x32xf32>
    %209 = vector.extract_strided_slice %107 {offsets = [3, 0], sizes = [5, 32], strides = [1, 1]} : vector<8x32xf32> to vector<5x32xf32>
    %210 = vector.extract_strided_slice %107 {offsets = [0, 0], sizes = [3, 32], strides = [1, 1]} : vector<8x32xf32> to vector<3x32xf32>
    %211 = tpu.concatenate %209, %210 in 0 : vector<5x32xf32>, vector<3x32xf32> -> vector<8x32xf32>
    %c0_i32_53 = arith.constant 0 : i32
    %212 = vector.broadcast %c0_i32_53 : i32 to vector<8x32xi32>
    %213 = arith.cmpi sge, %4, %212 : vector<8x32xi32>
    %c5_i32_54 = arith.constant 5 : i32
    %214 = vector.broadcast %c5_i32_54 : i32 to vector<8x32xi32>
    %215 = arith.cmpi slt, %4, %214 : vector<8x32xi32>
    %216 = arith.andi %213, %215 : vector<8x32xi1>
    %cst_55 = arith.constant 0.000000e+00 : f32
    %217 = vector.broadcast %cst_55 : f32 to vector<8x32xf32>
    %218 = arith.select %216, %211, %217 : vector<8x32xi1>, vector<8x32xf32>
    %219 = arith.addf %208, %218 : vector<8x32xf32>
    %220 = vector.extract_strided_slice %107 {offsets = [4, 0], sizes = [4, 32], strides = [1, 1]} : vector<8x32xf32> to vector<4x32xf32>
    %221 = vector.extract_strided_slice %107 {offsets = [0, 0], sizes = [4, 32], strides = [1, 1]} : vector<8x32xf32> to vector<4x32xf32>
    %222 = tpu.concatenate %220, %221 in 0 : vector<4x32xf32>, vector<4x32xf32> -> vector<8x32xf32>
    %c0_i32_56 = arith.constant 0 : i32
    %223 = vector.broadcast %c0_i32_56 : i32 to vector<8x32xi32>
    %224 = arith.cmpi sge, %4, %223 : vector<8x32xi32>
    %c4_i32_57 = arith.constant 4 : i32
    %225 = vector.broadcast %c4_i32_57 : i32 to vector<8x32xi32>
    %226 = arith.cmpi slt, %4, %225 : vector<8x32xi32>
    %227 = arith.andi %224, %226 : vector<8x32xi1>
    %cst_58 = arith.constant 0.000000e+00 : f32
    %228 = vector.broadcast %cst_58 : f32 to vector<8x32xf32>
    %229 = arith.select %227, %222, %228 : vector<8x32xi1>, vector<8x32xf32>
    %230 = arith.addf %219, %229 : vector<8x32xf32>
    %231 = vector.extract_strided_slice %107 {offsets = [5, 0], sizes = [3, 32], strides = [1, 1]} : vector<8x32xf32> to vector<3x32xf32>
    %232 = vector.extract_strided_slice %107 {offsets = [0, 0], sizes = [5, 32], strides = [1, 1]} : vector<8x32xf32> to vector<5x32xf32>
    %233 = tpu.concatenate %231, %232 in 0 : vector<3x32xf32>, vector<5x32xf32> -> vector<8x32xf32>
    %c0_i32_59 = arith.constant 0 : i32
    %234 = vector.broadcast %c0_i32_59 : i32 to vector<8x32xi32>
    %235 = arith.cmpi sge, %4, %234 : vector<8x32xi32>
    %c3_i32_60 = arith.constant 3 : i32
    %236 = vector.broadcast %c3_i32_60 : i32 to vector<8x32xi32>
    %237 = arith.cmpi slt, %4, %236 : vector<8x32xi32>
    %238 = arith.andi %235, %237 : vector<8x32xi1>
    %cst_61 = arith.constant 0.000000e+00 : f32
    %239 = vector.broadcast %cst_61 : f32 to vector<8x32xf32>
    %240 = arith.select %238, %233, %239 : vector<8x32xi1>, vector<8x32xf32>
    %241 = arith.addf %230, %240 : vector<8x32xf32>
    %242 = vector.extract_strided_slice %107 {offsets = [6, 0], sizes = [2, 32], strides = [1, 1]} : vector<8x32xf32> to vector<2x32xf32>
    %243 = vector.extract_strided_slice %107 {offsets = [0, 0], sizes = [6, 32], strides = [1, 1]} : vector<8x32xf32> to vector<6x32xf32>
    %244 = tpu.concatenate %242, %243 in 0 : vector<2x32xf32>, vector<6x32xf32> -> vector<8x32xf32>
    %c0_i32_62 = arith.constant 0 : i32
    %245 = vector.broadcast %c0_i32_62 : i32 to vector<8x32xi32>
    %246 = arith.cmpi sge, %4, %245 : vector<8x32xi32>
    %c2_i32_63 = arith.constant 2 : i32
    %247 = vector.broadcast %c2_i32_63 : i32 to vector<8x32xi32>
    %248 = arith.cmpi slt, %4, %247 : vector<8x32xi32>
    %249 = arith.andi %246, %248 : vector<8x32xi1>
    %cst_64 = arith.constant 0.000000e+00 : f32
    %250 = vector.broadcast %cst_64 : f32 to vector<8x32xf32>
    %251 = arith.select %249, %244, %250 : vector<8x32xi1>, vector<8x32xf32>
    %252 = arith.addf %241, %251 : vector<8x32xf32>
    %253 = vector.extract_strided_slice %107 {offsets = [7, 0], sizes = [1, 32], strides = [1, 1]} : vector<8x32xf32> to vector<1x32xf32>
    %254 = vector.extract_strided_slice %107 {offsets = [0, 0], sizes = [7, 32], strides = [1, 1]} : vector<8x32xf32> to vector<7x32xf32>
    %255 = tpu.concatenate %253, %254 in 0 : vector<1x32xf32>, vector<7x32xf32> -> vector<8x32xf32>
    %c0_i32_65 = arith.constant 0 : i32
    %256 = vector.broadcast %c0_i32_65 : i32 to vector<8x32xi32>
    %257 = arith.cmpi sge, %4, %256 : vector<8x32xi32>
    %c1_i32_66 = arith.constant 1 : i32
    %258 = vector.broadcast %c1_i32_66 : i32 to vector<8x32xi32>
    %259 = arith.cmpi slt, %4, %258 : vector<8x32xi32>
    %260 = arith.andi %257, %259 : vector<8x32xi1>
    %cst_67 = arith.constant 0.000000e+00 : f32
    %261 = vector.broadcast %cst_67 : f32 to vector<8x32xf32>
    %262 = arith.select %260, %255, %261 : vector<8x32xi1>, vector<8x32xf32>
    %263 = arith.addf %252, %262 : vector<8x32xf32>
    %cst_68 = arith.constant 0.0416666679 : f32
    %264 = vector.broadcast %cst_68 : f32 to vector<8x32xf32>
    %265 = arith.mulf %263, %264 : vector<8x32xf32>
    %266 = arith.subf %107, %265 : vector<8x32xf32>
    %267 = arith.truncf %266 : vector<8x32xf32> to vector<8x32xbf16>
    %c0_69 = arith.constant 0 : index
    %c0_70 = arith.constant 0 : index
    %268 = vector.load %arg6[%c0_69, %c0_70] : memref<32x64xbf16, #tpu.memory_space<vmem>>, vector<32x64xbf16>
    %cst_71 = arith.constant dense<0.000000e+00> : vector<8x64xf32>
    %269 = tpu.matmul %267, %268, %cst_71 {dimension_numbers = #tpu.dot_dimension_numbers<[1], [0], [0], [1], [0, 0, 1, 1], [], []>} : vector<8x32xbf16>, vector<32x64xbf16>, vector<8x64xf32> -> vector<8x64xf32>
    %c0_72 = arith.constant 0 : index
    %c0_73 = arith.constant 0 : index
    %270 = vector.load %arg7[%c0_72, %c0_73] : memref<1x64xf32, #tpu.memory_space<vmem>>, vector<1x64xf32>
    %271 = vector.broadcast %270 : vector<1x64xf32> to vector<8x64xf32>
    %272 = arith.addf %269, %271 : vector<8x64xf32>
    %cst_74 = arith.constant 0.000000e+00 : f32
    %273 = vector.broadcast %cst_74 : f32 to vector<8x64xf32>
    %274 = arith.maximumf %272, %273 : vector<8x64xf32>
    %275 = arith.truncf %274 : vector<8x64xf32> to vector<8x64xbf16>
    %c0_75 = arith.constant 0 : index
    %c0_76 = arith.constant 0 : index
    %276 = vector.load %arg8[%c0_75, %c0_76] : memref<64x32xbf16, #tpu.memory_space<vmem>>, vector<64x32xbf16>
    %cst_77 = arith.constant dense<0.000000e+00> : vector<8x32xf32>
    %277 = tpu.matmul %275, %276, %cst_77 {dimension_numbers = #tpu.dot_dimension_numbers<[1], [0], [0], [1], [0, 0, 1, 1], [], []>} : vector<8x64xbf16>, vector<64x32xbf16>, vector<8x32xf32> -> vector<8x32xf32>
    %c0_78 = arith.constant 0 : index
    %c0_79 = arith.constant 0 : index
    %278 = vector.load %arg9[%c0_78, %c0_79] : memref<1x32xf32, #tpu.memory_space<vmem>>, vector<1x32xf32>
    %279 = vector.broadcast %278 : vector<1x32xf32> to vector<8x32xf32>
    %280 = arith.addf %277, %279 : vector<8x32xf32>
    %281 = arith.addf %266, %280 : vector<8x32xf32>
    %cst_80 = arith.constant 0.000000e+00 : f32
    %282 = vector.broadcast %cst_80 : f32 to vector<8x32xf32>
    %283 = vector.extract_strided_slice %281 {offsets = [1, 0], sizes = [7, 32], strides = [1, 1]} : vector<8x32xf32> to vector<7x32xf32>
    %284 = vector.extract_strided_slice %281 {offsets = [0, 0], sizes = [1, 32], strides = [1, 1]} : vector<8x32xf32> to vector<1x32xf32>
    %285 = tpu.concatenate %283, %284 in 0 : vector<7x32xf32>, vector<1x32xf32> -> vector<8x32xf32>
    %c7_i32_81 = arith.constant 7 : i32
    %286 = vector.broadcast %c7_i32_81 : i32 to vector<8x32xi32>
    %287 = arith.cmpi sge, %4, %286 : vector<8x32xi32>
    %c8_i32_82 = arith.constant 8 : i32
    %288 = vector.broadcast %c8_i32_82 : i32 to vector<8x32xi32>
    %289 = arith.cmpi slt, %4, %288 : vector<8x32xi32>
    %290 = arith.andi %287, %289 : vector<8x32xi1>
    %cst_83 = arith.constant 0.000000e+00 : f32
    %291 = vector.broadcast %cst_83 : f32 to vector<8x32xf32>
    %292 = arith.select %290, %285, %291 : vector<8x32xi1>, vector<8x32xf32>
    %293 = arith.addf %282, %292 : vector<8x32xf32>
    %294 = vector.extract_strided_slice %281 {offsets = [2, 0], sizes = [6, 32], strides = [1, 1]} : vector<8x32xf32> to vector<6x32xf32>
    %295 = vector.extract_strided_slice %281 {offsets = [0, 0], sizes = [2, 32], strides = [1, 1]} : vector<8x32xf32> to vector<2x32xf32>
    %296 = tpu.concatenate %294, %295 in 0 : vector<6x32xf32>, vector<2x32xf32> -> vector<8x32xf32>
    %c6_i32_84 = arith.constant 6 : i32
    %297 = vector.broadcast %c6_i32_84 : i32 to vector<8x32xi32>
    %298 = arith.cmpi sge, %4, %297 : vector<8x32xi32>
    %c8_i32_85 = arith.constant 8 : i32
    %299 = vector.broadcast %c8_i32_85 : i32 to vector<8x32xi32>
    %300 = arith.cmpi slt, %4, %299 : vector<8x32xi32>
    %301 = arith.andi %298, %300 : vector<8x32xi1>
    %cst_86 = arith.constant 0.000000e+00 : f32
    %302 = vector.broadcast %cst_86 : f32 to vector<8x32xf32>
    %303 = arith.select %301, %296, %302 : vector<8x32xi1>, vector<8x32xf32>
    %304 = arith.addf %293, %303 : vector<8x32xf32>
    %305 = vector.extract_strided_slice %281 {offsets = [3, 0], sizes = [5, 32], strides = [1, 1]} : vector<8x32xf32> to vector<5x32xf32>
    %306 = vector.extract_strided_slice %281 {offsets = [0, 0], sizes = [3, 32], strides = [1, 1]} : vector<8x32xf32> to vector<3x32xf32>
    %307 = tpu.concatenate %305, %306 in 0 : vector<5x32xf32>, vector<3x32xf32> -> vector<8x32xf32>
    %c5_i32_87 = arith.constant 5 : i32
    %308 = vector.broadcast %c5_i32_87 : i32 to vector<8x32xi32>
    %309 = arith.cmpi sge, %4, %308 : vector<8x32xi32>
    %c8_i32_88 = arith.constant 8 : i32
    %310 = vector.broadcast %c8_i32_88 : i32 to vector<8x32xi32>
    %311 = arith.cmpi slt, %4, %310 : vector<8x32xi32>
    %312 = arith.andi %309, %311 : vector<8x32xi1>
    %cst_89 = arith.constant 0.000000e+00 : f32
    %313 = vector.broadcast %cst_89 : f32 to vector<8x32xf32>
    %314 = arith.select %312, %307, %313 : vector<8x32xi1>, vector<8x32xf32>
    %315 = arith.addf %304, %314 : vector<8x32xf32>
    %316 = vector.extract_strided_slice %281 {offsets = [4, 0], sizes = [4, 32], strides = [1, 1]} : vector<8x32xf32> to vector<4x32xf32>
    %317 = vector.extract_strided_slice %281 {offsets = [0, 0], sizes = [4, 32], strides = [1, 1]} : vector<8x32xf32> to vector<4x32xf32>
    %318 = tpu.concatenate %316, %317 in 0 : vector<4x32xf32>, vector<4x32xf32> -> vector<8x32xf32>
    %c4_i32_90 = arith.constant 4 : i32
    %319 = vector.broadcast %c4_i32_90 : i32 to vector<8x32xi32>
    %320 = arith.cmpi sge, %4, %319 : vector<8x32xi32>
    %c8_i32_91 = arith.constant 8 : i32
    %321 = vector.broadcast %c8_i32_91 : i32 to vector<8x32xi32>
    %322 = arith.cmpi slt, %4, %321 : vector<8x32xi32>
    %323 = arith.andi %320, %322 : vector<8x32xi1>
    %cst_92 = arith.constant 0.000000e+00 : f32
    %324 = vector.broadcast %cst_92 : f32 to vector<8x32xf32>
    %325 = arith.select %323, %318, %324 : vector<8x32xi1>, vector<8x32xf32>
    %326 = arith.addf %315, %325 : vector<8x32xf32>
    %327 = vector.extract_strided_slice %281 {offsets = [5, 0], sizes = [3, 32], strides = [1, 1]} : vector<8x32xf32> to vector<3x32xf32>
    %328 = vector.extract_strided_slice %281 {offsets = [0, 0], sizes = [5, 32], strides = [1, 1]} : vector<8x32xf32> to vector<5x32xf32>
    %329 = tpu.concatenate %327, %328 in 0 : vector<3x32xf32>, vector<5x32xf32> -> vector<8x32xf32>
    %c3_i32_93 = arith.constant 3 : i32
    %330 = vector.broadcast %c3_i32_93 : i32 to vector<8x32xi32>
    %331 = arith.cmpi sge, %4, %330 : vector<8x32xi32>
    %c8_i32_94 = arith.constant 8 : i32
    %332 = vector.broadcast %c8_i32_94 : i32 to vector<8x32xi32>
    %333 = arith.cmpi slt, %4, %332 : vector<8x32xi32>
    %334 = arith.andi %331, %333 : vector<8x32xi1>
    %cst_95 = arith.constant 0.000000e+00 : f32
    %335 = vector.broadcast %cst_95 : f32 to vector<8x32xf32>
    %336 = arith.select %334, %329, %335 : vector<8x32xi1>, vector<8x32xf32>
    %337 = arith.addf %326, %336 : vector<8x32xf32>
    %338 = vector.extract_strided_slice %281 {offsets = [6, 0], sizes = [2, 32], strides = [1, 1]} : vector<8x32xf32> to vector<2x32xf32>
    %339 = vector.extract_strided_slice %281 {offsets = [0, 0], sizes = [6, 32], strides = [1, 1]} : vector<8x32xf32> to vector<6x32xf32>
    %340 = tpu.concatenate %338, %339 in 0 : vector<2x32xf32>, vector<6x32xf32> -> vector<8x32xf32>
    %c2_i32_96 = arith.constant 2 : i32
    %341 = vector.broadcast %c2_i32_96 : i32 to vector<8x32xi32>
    %342 = arith.cmpi sge, %4, %341 : vector<8x32xi32>
    %c8_i32_97 = arith.constant 8 : i32
    %343 = vector.broadcast %c8_i32_97 : i32 to vector<8x32xi32>
    %344 = arith.cmpi slt, %4, %343 : vector<8x32xi32>
    %345 = arith.andi %342, %344 : vector<8x32xi1>
    %cst_98 = arith.constant 0.000000e+00 : f32
    %346 = vector.broadcast %cst_98 : f32 to vector<8x32xf32>
    %347 = arith.select %345, %340, %346 : vector<8x32xi1>, vector<8x32xf32>
    %348 = arith.addf %337, %347 : vector<8x32xf32>
    %349 = vector.extract_strided_slice %281 {offsets = [7, 0], sizes = [1, 32], strides = [1, 1]} : vector<8x32xf32> to vector<1x32xf32>
    %350 = vector.extract_strided_slice %281 {offsets = [0, 0], sizes = [7, 32], strides = [1, 1]} : vector<8x32xf32> to vector<7x32xf32>
    %351 = tpu.concatenate %349, %350 in 0 : vector<1x32xf32>, vector<7x32xf32> -> vector<8x32xf32>
    %c1_i32_99 = arith.constant 1 : i32
    %352 = vector.broadcast %c1_i32_99 : i32 to vector<8x32xi32>
    %353 = arith.cmpi sge, %4, %352 : vector<8x32xi32>
    %c8_i32_100 = arith.constant 8 : i32
    %354 = vector.broadcast %c8_i32_100 : i32 to vector<8x32xi32>
    %355 = arith.cmpi slt, %4, %354 : vector<8x32xi32>
    %356 = arith.andi %353, %355 : vector<8x32xi1>
    %cst_101 = arith.constant 0.000000e+00 : f32
    %357 = vector.broadcast %cst_101 : f32 to vector<8x32xf32>
    %358 = arith.select %356, %351, %357 : vector<8x32xi1>, vector<8x32xf32>
    %359 = arith.addf %348, %358 : vector<8x32xf32>
    %360 = arith.addf %359, %281 : vector<8x32xf32>
    %361 = vector.extract_strided_slice %281 {offsets = [1, 0], sizes = [7, 32], strides = [1, 1]} : vector<8x32xf32> to vector<7x32xf32>
    %362 = vector.extract_strided_slice %281 {offsets = [0, 0], sizes = [1, 32], strides = [1, 1]} : vector<8x32xf32> to vector<1x32xf32>
    %363 = tpu.concatenate %361, %362 in 0 : vector<7x32xf32>, vector<1x32xf32> -> vector<8x32xf32>
    %c0_i32_102 = arith.constant 0 : i32
    %364 = vector.broadcast %c0_i32_102 : i32 to vector<8x32xi32>
    %365 = arith.cmpi sge, %4, %364 : vector<8x32xi32>
    %c7_i32_103 = arith.constant 7 : i32
    %366 = vector.broadcast %c7_i32_103 : i32 to vector<8x32xi32>
    %367 = arith.cmpi slt, %4, %366 : vector<8x32xi32>
    %368 = arith.andi %365, %367 : vector<8x32xi1>
    %cst_104 = arith.constant 0.000000e+00 : f32
    %369 = vector.broadcast %cst_104 : f32 to vector<8x32xf32>
    %370 = arith.select %368, %363, %369 : vector<8x32xi1>, vector<8x32xf32>
    %371 = arith.addf %360, %370 : vector<8x32xf32>
    %372 = vector.extract_strided_slice %281 {offsets = [2, 0], sizes = [6, 32], strides = [1, 1]} : vector<8x32xf32> to vector<6x32xf32>
    %373 = vector.extract_strided_slice %281 {offsets = [0, 0], sizes = [2, 32], strides = [1, 1]} : vector<8x32xf32> to vector<2x32xf32>
    %374 = tpu.concatenate %372, %373 in 0 : vector<6x32xf32>, vector<2x32xf32> -> vector<8x32xf32>
    %c0_i32_105 = arith.constant 0 : i32
    %375 = vector.broadcast %c0_i32_105 : i32 to vector<8x32xi32>
    %376 = arith.cmpi sge, %4, %375 : vector<8x32xi32>
    %c6_i32_106 = arith.constant 6 : i32
    %377 = vector.broadcast %c6_i32_106 : i32 to vector<8x32xi32>
    %378 = arith.cmpi slt, %4, %377 : vector<8x32xi32>
    %379 = arith.andi %376, %378 : vector<8x32xi1>
    %cst_107 = arith.constant 0.000000e+00 : f32
    %380 = vector.broadcast %cst_107 : f32 to vector<8x32xf32>
    %381 = arith.select %379, %374, %380 : vector<8x32xi1>, vector<8x32xf32>
    %382 = arith.addf %371, %381 : vector<8x32xf32>
    %383 = vector.extract_strided_slice %281 {offsets = [3, 0], sizes = [5, 32], strides = [1, 1]} : vector<8x32xf32> to vector<5x32xf32>
    %384 = vector.extract_strided_slice %281 {offsets = [0, 0], sizes = [3, 32], strides = [1, 1]} : vector<8x32xf32> to vector<3x32xf32>
    %385 = tpu.concatenate %383, %384 in 0 : vector<5x32xf32>, vector<3x32xf32> -> vector<8x32xf32>
    %c0_i32_108 = arith.constant 0 : i32
    %386 = vector.broadcast %c0_i32_108 : i32 to vector<8x32xi32>
    %387 = arith.cmpi sge, %4, %386 : vector<8x32xi32>
    %c5_i32_109 = arith.constant 5 : i32
    %388 = vector.broadcast %c5_i32_109 : i32 to vector<8x32xi32>
    %389 = arith.cmpi slt, %4, %388 : vector<8x32xi32>
    %390 = arith.andi %387, %389 : vector<8x32xi1>
    %cst_110 = arith.constant 0.000000e+00 : f32
    %391 = vector.broadcast %cst_110 : f32 to vector<8x32xf32>
    %392 = arith.select %390, %385, %391 : vector<8x32xi1>, vector<8x32xf32>
    %393 = arith.addf %382, %392 : vector<8x32xf32>
    %394 = vector.extract_strided_slice %281 {offsets = [4, 0], sizes = [4, 32], strides = [1, 1]} : vector<8x32xf32> to vector<4x32xf32>
    %395 = vector.extract_strided_slice %281 {offsets = [0, 0], sizes = [4, 32], strides = [1, 1]} : vector<8x32xf32> to vector<4x32xf32>
    %396 = tpu.concatenate %394, %395 in 0 : vector<4x32xf32>, vector<4x32xf32> -> vector<8x32xf32>
    %c0_i32_111 = arith.constant 0 : i32
    %397 = vector.broadcast %c0_i32_111 : i32 to vector<8x32xi32>
    %398 = arith.cmpi sge, %4, %397 : vector<8x32xi32>
    %c4_i32_112 = arith.constant 4 : i32
    %399 = vector.broadcast %c4_i32_112 : i32 to vector<8x32xi32>
    %400 = arith.cmpi slt, %4, %399 : vector<8x32xi32>
    %401 = arith.andi %398, %400 : vector<8x32xi1>
    %cst_113 = arith.constant 0.000000e+00 : f32
    %402 = vector.broadcast %cst_113 : f32 to vector<8x32xf32>
    %403 = arith.select %401, %396, %402 : vector<8x32xi1>, vector<8x32xf32>
    %404 = arith.addf %393, %403 : vector<8x32xf32>
    %405 = vector.extract_strided_slice %281 {offsets = [5, 0], sizes = [3, 32], strides = [1, 1]} : vector<8x32xf32> to vector<3x32xf32>
    %406 = vector.extract_strided_slice %281 {offsets = [0, 0], sizes = [5, 32], strides = [1, 1]} : vector<8x32xf32> to vector<5x32xf32>
    %407 = tpu.concatenate %405, %406 in 0 : vector<3x32xf32>, vector<5x32xf32> -> vector<8x32xf32>
    %c0_i32_114 = arith.constant 0 : i32
    %408 = vector.broadcast %c0_i32_114 : i32 to vector<8x32xi32>
    %409 = arith.cmpi sge, %4, %408 : vector<8x32xi32>
    %c3_i32_115 = arith.constant 3 : i32
    %410 = vector.broadcast %c3_i32_115 : i32 to vector<8x32xi32>
    %411 = arith.cmpi slt, %4, %410 : vector<8x32xi32>
    %412 = arith.andi %409, %411 : vector<8x32xi1>
    %cst_116 = arith.constant 0.000000e+00 : f32
    %413 = vector.broadcast %cst_116 : f32 to vector<8x32xf32>
    %414 = arith.select %412, %407, %413 : vector<8x32xi1>, vector<8x32xf32>
    %415 = arith.addf %404, %414 : vector<8x32xf32>
    %416 = vector.extract_strided_slice %281 {offsets = [6, 0], sizes = [2, 32], strides = [1, 1]} : vector<8x32xf32> to vector<2x32xf32>
    %417 = vector.extract_strided_slice %281 {offsets = [0, 0], sizes = [6, 32], strides = [1, 1]} : vector<8x32xf32> to vector<6x32xf32>
    %418 = tpu.concatenate %416, %417 in 0 : vector<2x32xf32>, vector<6x32xf32> -> vector<8x32xf32>
    %c0_i32_117 = arith.constant 0 : i32
    %419 = vector.broadcast %c0_i32_117 : i32 to vector<8x32xi32>
    %420 = arith.cmpi sge, %4, %419 : vector<8x32xi32>
    %c2_i32_118 = arith.constant 2 : i32
    %421 = vector.broadcast %c2_i32_118 : i32 to vector<8x32xi32>
    %422 = arith.cmpi slt, %4, %421 : vector<8x32xi32>
    %423 = arith.andi %420, %422 : vector<8x32xi1>
    %cst_119 = arith.constant 0.000000e+00 : f32
    %424 = vector.broadcast %cst_119 : f32 to vector<8x32xf32>
    %425 = arith.select %423, %418, %424 : vector<8x32xi1>, vector<8x32xf32>
    %426 = arith.addf %415, %425 : vector<8x32xf32>
    %427 = vector.extract_strided_slice %281 {offsets = [7, 0], sizes = [1, 32], strides = [1, 1]} : vector<8x32xf32> to vector<1x32xf32>
    %428 = vector.extract_strided_slice %281 {offsets = [0, 0], sizes = [7, 32], strides = [1, 1]} : vector<8x32xf32> to vector<7x32xf32>
    %429 = tpu.concatenate %427, %428 in 0 : vector<1x32xf32>, vector<7x32xf32> -> vector<8x32xf32>
    %c0_i32_120 = arith.constant 0 : i32
    %430 = vector.broadcast %c0_i32_120 : i32 to vector<8x32xi32>
    %431 = arith.cmpi sge, %4, %430 : vector<8x32xi32>
    %c1_i32_121 = arith.constant 1 : i32
    %432 = vector.broadcast %c1_i32_121 : i32 to vector<8x32xi32>
    %433 = arith.cmpi slt, %4, %432 : vector<8x32xi32>
    %434 = arith.andi %431, %433 : vector<8x32xi1>
    %cst_122 = arith.constant 0.000000e+00 : f32
    %435 = vector.broadcast %cst_122 : f32 to vector<8x32xf32>
    %436 = arith.select %434, %429, %435 : vector<8x32xi1>, vector<8x32xf32>
    %437 = arith.addf %426, %436 : vector<8x32xf32>
    %cst_123 = arith.constant 0.0416666679 : f32
    %438 = vector.broadcast %cst_123 : f32 to vector<8x32xf32>
    %439 = arith.mulf %437, %438 : vector<8x32xf32>
    %440 = arith.subf %281, %439 : vector<8x32xf32>
    %441 = vector.shape_cast %440 : vector<8x32xf32> to vector<1x8x32xf32>
    %c0_124 = arith.constant 0 : index
    %c0_125 = arith.constant 0 : index
    %c0_126 = arith.constant 0 : index
    %442 = vector.load %arg10[%c0_124, %c0_125, %c0_126] : memref<1x8x32xf32, #tpu.memory_space<vmem>>, vector<1x8x32xf32>
    tpu.vector_store %arg10[%c0_124, %c0_125, %c0_126], %441 {strides = array<i32>} : memref<1x8x32xf32, #tpu.memory_space<vmem>>, vector<1x8x32xf32>,
    return
  }
  func.func @transform_0(%arg0: i32) -> (i32, i32, i32) {
    %c0_i32 = arith.constant 0 : i32
    %c0_i32_0 = arith.constant 0 : i32
    %c0_i32_1 = arith.constant 0 : i32
    return %arg0, %c0_i32, %c0_i32_0 : i32, i32, i32
  }
  func.func @transform_1(%arg0: i32) -> (i32, i32) {
    %c0_i32 = arith.constant 0 : i32
    %c0_i32_0 = arith.constant 0 : i32
    %c0_i32_1 = arith.constant 0 : i32
    return %c0_i32, %c0_i32_0 : i32, i32
  }
  func.func @transform_2(%arg0: i32) -> (i32, i32) {
    %c0_i32 = arith.constant 0 : i32
    %c0_i32_0 = arith.constant 0 : i32
    %c0_i32_1 = arith.constant 0 : i32
    return %c0_i32, %c0_i32_0 : i32, i32
  }
  func.func @transform_3(%arg0: i32) -> (i32, i32) {
    %c0_i32 = arith.constant 0 : i32
    %c0_i32_0 = arith.constant 0 : i32
    %c0_i32_1 = arith.constant 0 : i32
    return %c0_i32, %c0_i32_0 : i32, i32
  }
  func.func @transform_4(%arg0: i32) -> (i32, i32) {
    %c0_i32 = arith.constant 0 : i32
    %c0_i32_0 = arith.constant 0 : i32
    %c0_i32_1 = arith.constant 0 : i32
    return %c0_i32, %c0_i32_0 : i32, i32
  }
  func.func @transform_5(%arg0: i32) -> (i32, i32) {
    %c0_i32 = arith.constant 0 : i32
    %c0_i32_0 = arith.constant 0 : i32
    %c0_i32_1 = arith.constant 0 : i32
    return %c0_i32, %c0_i32_0 : i32, i32
  }
  func.func @transform_6(%arg0: i32) -> (i32, i32) {
    %c0_i32 = arith.constant 0 : i32
    %c0_i32_0 = arith.constant 0 : i32
    %c0_i32_1 = arith.constant 0 : i32
    return %c0_i32, %c0_i32_0 : i32, i32
  }
  func.func @transform_7(%arg0: i32) -> (i32, i32) {
    %c0_i32 = arith.constant 0 : i32
    %c0_i32_0 = arith.constant 0 : i32
    %c0_i32_1 = arith.constant 0 : i32
    return %c0_i32, %c0_i32_0 : i32, i32
  }
  func.func @transform_8(%arg0: i32) -> (i32, i32) {
    %c0_i32 = arith.constant 0 : i32
    %c0_i32_0 = arith.constant 0 : i32
    %c0_i32_1 = arith.constant 0 : i32
    return %c0_i32, %c0_i32_0 : i32, i32
  }
  func.func @transform_9(%arg0: i32) -> (i32, i32, i32) {
    %c0_i32 = arith.constant 0 : i32
    %c0_i32_0 = arith.constant 0 : i32
    %c0_i32_1 = arith.constant 0 : i32
    return %arg0, %c0_i32, %c0_i32_0 : i32, i32, i32
  }
}

</mosaic_0001>

<bundles_post_ra>
// kernel: tpu_custom_call.1
= control target key start
LH: loop header
LB: loop body
LE: loop exit
PB: predicated region body
PF: predicated region fallthrough
CT: control target
= control target key end

     0   :  { %14 = vsyncpa [#allocation4], 0  ;;  %s2071_s0 = inlined_call_operand.vmem [shape: f32[2,8,32], index: 0, kind: input, shape index: {}]   ;;  %s2072_s1 = inlined_call_operand.vmem [shape: bf16[32,96], index: 1, kind: input, shape index: {}]   ;;  %s2073_s2 = inlined_call_operand.vmem [shape: f32[1,96], index: 2, kind: input, shape index: {}]   ;;  %s2074_s3 = inlined_call_operand.vmem [shape: bf16[32,32], index: 3, kind: input, shape index: {}]   ;;  %s2075_s4 = inlined_call_operand.vmem [shape: f32[1,32], index: 4, kind: input, shape index: {}]   ;;  %s2076_s5 = inlined_call_operand.hbm [shape: bf16[32,64], index: 5, kind: input, shape index: {}]   ;;  %s2077_s6 = inlined_call_operand.vmem [shape: f32[1,64], index: 6, kind: input, shape index: {}]   ;;  %s2078_s7 = inlined_call_operand.vmem [shape: bf16[64,32], index: 7, kind: input, shape index: {}]   ;;  %s2079_s8 = inlined_call_operand.vmem [shape: f32[1,32], index: 8, kind: input, shape index: {}]   ;;  %s2080_s9 = inlined_call_operand.hbm [shape: f32[2,8,32], index: 9, kind: output, shape index: {}]  }
   0x1   :  { %15 = vsyncpa [#allocation5], 0 }
   0x2   :  { %17 = vsyncpa [#allocation5 + $0x1], 0  ;;  %s1738_s30 = smov 0   ;;  %s1740_s10 = smov 0  }
   0x3   :  { %s1742_s11 = smov 0   ;;  %s1744_s12 = smov 0  }
   0x4 LB: > { %s1759_s13 = sadd.s32 4294967295, %s1666_s12   ;;  %s1326_s14 = sadd.s32 4294967294, %s1666_s12   ;;  %s1666_s12 = sphi %s1744_s12, %s2096_s12   ;;  %s1662_s11 = sphi %s1742_s11, %s2095_s11   ;;  %s1658_s10 = sphi %s1740_s10, %s2094_s10   ;;  %s1654_s30 = sphi %s1738_s30, %s2093_s30  }
   0x5   : > { %s1763_s15 = sadd.s32 1, %s1666_s12   ;;  %s224_s16 = sadd.s32 1, %s1662_s11 }
   0x6   : > { %s221_s17 = ssub.s32 %s1666_s12, %s1763_s15  ;;  %p234_p0 = scmp.ne.s32.totalorder %s1662_s11, %s1658_s10 }
   0x7   : > { %p222_p1 = scmp.eq.s32.totalorder %s221_s17, 0  ;;  %p235_p2 = scmp.eq.s32.totalorder %s1759_s13, 1 }
   0x8   : > { %p240_p3 = scmp.ne.s32.totalorder %s1658_s10, %s1654_s30  ;;  %p241_p4 = scmp.eq.s32.totalorder %s1326_s14, 1 }
   0x9   : > { %s1774_s18 = scalar_select %p222_p1, %s1662_s11, %s224_s16  }
   0xa   : > { %p1776_p5 = por %p235_p2, %p234_p0  ;;  %p1780_p6 = por %p241_p4, %p240_p3 }
   0xb   : > { %p1327_p7 = scmp.ge.s32.totalorder %s1666_s12, 1  ;;  %p248_p8 = scmp.lt.s32.totalorder %s1666_s12, 3 }
   0xc   : > { %s2084_s19 = scalar_select %p1776_p5, 1, 0 }
   0xd   : > { %s2085_s20 = scalar_select %p1780_p6, 1, 0 }
   0xe   : > { %p2081_p9 = scmp.eq.s32.totalorder %s1759_s13, 0  ;;  %p1787_p10 = pnand %p1327_p7, %p248_p8 }
   0xf   : > { %s1668_s22 = smov [#allocation3]   ;;  %s1572_s27 = scalar_lea.hbm %s2076_s5, 256 }
  0x10   : > { %s2086_s21 = scalar_select %p1787_p10, 1, 0 }
  0x11   : > { %s272_s23 = sshll.u32 %s1668_s22, 4  ;;  %p1484_p11 = pneg %p1787_p10  ;;  %s273_s23 = int_to_ptr.vmem [resolvable:$true] %s272_s23 }
  0x12   : > { %p1573_p13 = scmp.ne.s32.totalorder %s2076_s5, %s1572_s27  ;;  %p1579_p3 = scmp.lt.u32.totalorder %s1572_s27, %s2076_s5 }
  0x13   : > { %p1795_p12 = pnand %p2081_p9, %p1484_p11 }
  0x15   : > { %p1574_p0 = pneg %p1795_p12 }
  0x17   : > { %p1575_p1 = pnand %p1574_p0, %p1573_p13 }
  0x19   : > { %p1576_p2 = pneg %p1575_p1 }
  0x1b   : > { %p1581_p4 = pnand %p1579_p3, %p1576_p2 }
  0x1d   : > { %1584 = shalt.err (!%p1581_p4)
}
  0x1e   : > { %s1585_s17 = scalar_lea.vmem %s273_s23, 256  ;;  %p1593_p9 = scmp.lt.s32.totalorder %s273_s23, %s273_s23 }
  0x1f   : > { %p1586_p7 = scmp.ne.s32.totalorder %s273_s23, %s1585_s17  ;;  %p1594_p6 = scmp.lt.s32.totalorder %s1585_s17, %s1585_s17 }
  0x21   : > { %p1588_p8 = pnand %p1586_p7, %p1574_p0  ;;  %p1595_p5 = por %p1594_p6, %p1593_p9 }
  0x23   : > { %p1589_p11 = pneg %p1588_p8 }
  0x25   : > { %p1596_p10 = pnand %p1595_p5, %p1589_p11 }
  0x27   : > { %1599 = shalt.err (!%p1596_p10)
}
  0x28   : > { %s1669_s22 = smov 64   ;;  %s1670_s25 = smov 4  }
  0x29   : > { %1487 = dma.hbm_to_vmem [thread:$0]  (!%p1795_p12), %s2076_s5, 256, %s273_s23, [#allocation4], %s1669_s22, %s1669_s22, %s1670_s25  }
  0x2a   : > { %p2088_p13 = scmp.ne.s32.totalorder %s2086_s21, 0 }
  0x2b   : > { %p2089_p1 = scmp.eq.s32.totalorder (!%p2088_p13), %s1759_s13, 0 }
  0x2c   : > { %304 = sbr.rel (%p2088_p13) target bundleno = 2064 (0x810), region = 56 }
  0x33   : > { %1645 = dma.done.wait (%p2089_p1), [#allocation4], 256   ;;  %p2090_p0 = pmov %p2089_p1 }
  0x34   : > { %p339_p5 = scmp.lt.s32.totalorder %s1759_s13, 1  ;;  %v1671_v0 = vmov 0.0   ;;  %vm1672_vm0 = vmmov 0   ;;  %v1546_v1 = vld [vmem:[%s2072_s1] sm:$0xff]   ;;  %v1547_v2 = vld [vmem:[%s2072_s1 + $0x8] sm:$0xff]   ;;  %vm371_vm1 = vcmask 261120  }
  0x35   : > { %1647 = vsyncadd (%p2090_p0), [#allocation4], 4294967040  ;;  %1394 = vmatprep.subr.bf16.mxu0 %v1671_v0  ;;  %1398 = vmatprep.mubr.msk.bf16.mxu0 %vm1672_vm0, %v1671_v0  ;;  %v1334_v5 = vld [vmem:[%s2073_s2] ss:$0 sm:$0xff]  ;;  %s1673_s28 = smov 120   ;;  %s1676_s24 = smov 88  }
  0x36   : > { %s340_s23 = scalar_select %p339_p5, %s1759_s13, 1  ;;  %1402 = vmatprep.subr.bf16.mxu1 %v1671_v0  ;;  %1404 = vmatprep.mubr.msk.bf16.mxu1 %vm1672_vm0, %v1671_v0  ;;  %vm419_vm2 = vcmask 64512   ;;  %vm483_vm3 = vcmask 1043456   ;;  %vm642_vm4 = vcmask 130112   ;;  %vm758_vm5 = vcmask 195712  }
  0x37   : > { %1395 = vmatpush3.bf16.msra.mxu0 %v1546_v1  ;;  %s1677_s27 = smov 72   ;;  %s1679_s14 = smov 104   ;;  %vm874_vm6 = vcmask 261312  }
  0x38   : > { %s1333_s21 = sshll.u32 %s340_s23, 3  ;;  %1396 = vmatprep.subr.bf16.mxu0 %v1671_v0  ;;  %s1674_s23 = smov 96  }
  0x39   : > { %s342_s29 = scalar_lea.vmem %s2071_s0, %s1333_s21  ;;  %s1675_s21 = smov 80  }
  0x3a   : > { %v1838_v3 = vld [vmem:[%s342_s29] sm:$0xff]  ;;  %s1678_s29 = smov 112   ;;  %s1680_s16 = smov 56  }
  0x3b   : > { %v345_v4 = vpack.c.bf16 %v1838_v3, %v1838_v3  ;;  %1397 = vmatpush3.bf16.msra.mxu0 %v1547_v2  ;;  %s1681_s17 = smov 64   ;;  %s1682_s22 = smov 40  }
  0x3c   : > { %1408 = vmatprep.subr.bf16.mxu0 %v1671_v0  ;;  %s1683_s25 = smov 48   ;;  %s1684_s26 = smov 8  }
  0x3d   : > { %p2091_p9 = scmp.ne.s32.totalorder %s2084_s19, 0 }
  0x3e   : > { %1399 = vmatmul.mubr.msk.bf16.vlgmr.msra.gmra.mrb[0].mxu0 %vm371_vm1, %v345_v4 }
  0x3f   : > { %1410 = vmatprep.mubr.msk.bf16.mxu0 %vm1672_vm0, %v1671_v0 }
 0x111   : > { %v409_v6 = vpop.f32.mrb[0].mxu0 }
 0x112   : > { %v410_v7 = vadd.f32 %v1334_v5, %v409_v6  ;;  %v1400_v8 = vpop.f32.mrb[1].mxu0 }
 0x113   : > { %v412_v9 = vpop.f32.mrb[2].mxu0 }
 0x114   : > { %v1850_v10 = vpack.c.bf16 %v410_v7, %v410_v7  ;;  %v1401_v11 = vpop.f32.mrb[3].mxu0 }
 0x116   : > { %528 = vrot.lane.b32.xlu1 %v1850_v10, %s1673_s28  ;;  %417 = vrot.lane.b32.xlu0 %v1850_v10, %s1674_s23 }
 0x11a   : > { %646 = vrot.lane.b32.xlu1 %v1850_v10, %s1675_s21  ;;  %530 = vrot.lane.b32.xlu0 %v1850_v10, %s1676_s24 }
 0x11e   : > { %762 = vrot.lane.b32.xlu1 %v1850_v10, %s1677_s27  ;;  %644 = vrot.lane.b32.xlu0 %v1850_v10, %s1678_s29  ;;  %s1685_s27 = smov 16   ;;  %s1686_s29 = smov 24  }
 0x122   : > { %760 = vrot.lane.b32.xlu0 %v1850_v10, %s1679_s14 }
 0x188   : > { %v418_v12 = vpop.permute.xlu0 %417  ;;  %v529_v15 = vpop.permute.xlu1 %528 }
 0x189   : > { %v424_v13 = vsel %vm419_vm2, %v418_v12, 0 }
 0x18a   : > { %1403 = vmatpush3.bf16.xpose.msra.mxu1 %v424_v13 }
 0x18b   : > { %1414 = vmatprep.subr.bf16.mxu1 %v1671_v0 }
 0x18c   : > { %v531_v14 = vpop.permute.xlu0 %530  ;;  %v647_v17 = vpop.permute.xlu1 %646 }
 0x18d   : > { %v536_v16 = vsel %vm419_vm2, %v531_v14, 0  ;;  %v652_v18 = vsel %vm419_vm2, %v647_v17, 0 }
 0x190   : > { %v763_v19 = vpop.permute.xlu1 %762  ;;  %v645_v20 = vpop.permute.xlu0 %644 }
 0x191   : > { %1405 = vmatmul.mubr.msk.bf16.vlgmr.msra.gmra.mrb[0].mxu1 %vm419_vm2, %v1850_v10  ;;  %v768_v21 = vsel %vm419_vm2, %v763_v19, 0 }
 0x192   : > { %1415 = vmatpush3.bf16.xpose.msra.mxu1 %v536_v16  ;;  %1416 = vmatprep.mubr.msk.bf16.mxu1 %vm1672_vm0, %v1671_v0 }
 0x193   : > { %1426 = vmatprep.subr.bf16.mxu1 %v1671_v0 }
 0x194   : > { %v761_v22 = vpop.permute.xlu0 %760 }
 0x199   : > { %1417 = vmatmul.mubr.msk.bf16.vlgmr.msra.gmra.mrb[4].mxu1 %vm419_vm2, %v529_v15 }
 0x19a   : > { %1427 = vmatpush3.bf16.xpose.msra.mxu1 %v652_v18  ;;  %1428 = vmatprep.mubr.msk.bf16.mxu1 %vm1672_vm0, %v1671_v0 }
 0x19b   : > { %1438 = vmatprep.subr.bf16.mxu1 %v1671_v0 }
 0x1a1   : > { %1429 = vmatmul.mubr.msk.bf16.vlgmr.msra.gmra.mrb[8].mxu1 %vm419_vm2, %v645_v20 }
 0x1a2   : > { %1439 = vmatpush3.bf16.xpose.msra.mxu1 %v768_v21  ;;  %1440 = vmatprep.mubr.msk.bf16.mxu1 %vm1672_vm0, %v1671_v0 }
 0x1a3   : > { %1450 = vmatprep.subr.bf16.mxu1 %v1671_v0 }
 0x1a9   : > { %1441 = vmatmul.mubr.msk.bf16.vlgmr.msra.gmra.mrb[12].mxu1 %vm419_vm2, %v761_v22 }
 0x1aa   : > { %1454 = vmatprep.mubr.msk.bf16.mxu1 %vm1672_vm0, %v1671_v0 }
 0x264   : > { %v460_v23 = vpop.f32.mrb[0].mxu1 }
 0x265   : > { %v1406_v24 = vpop.f32.mrb[1].mxu1  ;;  %v466_v25 = vsel %vm419_vm2, %v460_v23, -inf }
 0x266   : > { %467 = vmax.xlane.f32.xlu1 %v466_v25  ;;  %v463_v26 = vpop.f32.mrb[2].mxu1 }
 0x267   : > { %v1407_v27 = vpop.f32.mrb[3].mxu1 }
 0x26c   : > { %v572_v28 = vpop.f32.mrb[4].mxu1 }
 0x26d   : > { %v1418_v29 = vpop.f32.mrb[5].mxu1  ;;  %v578_v30 = vsel %vm419_vm2, %v572_v28, -inf }
 0x26e   : > { %579 = vmax.xlane.f32.xlu0 %v578_v30  ;;  %v575_v31 = vpop.f32.mrb[6].mxu1 }
 0x26f   : > { %v1419_v32 = vpop.f32.mrb[7].mxu1 }
 0x274   : > { %v688_v33 = vpop.f32.mrb[8].mxu1 }
 0x275   : > { %v1430_v34 = vpop.f32.mrb[9].mxu1  ;;  %v694_v35 = vsel %vm419_vm2, %v688_v33, -inf }
 0x276   : > { %695 = vmax.xlane.f32.xlu0 %v694_v35  ;;  %v691_v36 = vpop.f32.mrb[10].mxu1  ;;  %v1549_v34 = vld [vmem:[%s2074_s3 + $0x8] sm:$0xff]  }
 0x277   : > { %v1431_v37 = vpop.f32.mrb[11].mxu1 }
 0x27c   : > { %v804_v38 = vpop.f32.mrb[12].mxu1 }
 0x27d   : > { %v1442_v39 = vpop.f32.mrb[13].mxu1  ;;  %v810_v40 = vsel %vm419_vm2, %v804_v38, -inf }
 0x27e   : > { %811 = vmax.xlane.f32.xlu1 %v810_v40  ;;  %v807_v41 = vpop.f32.mrb[14].mxu1 }
 0x27f   : > { %v1443_v42 = vpop.f32.mrb[15].mxu1 }
 0x2f3   : > { %v468_v43 = vpop.xlane.xlu1 %467 }
 0x2f4   : > { %v469_v44 = vsub.f32 %v460_v23, %v468_v43 }
 0x2f6   : > { %v470_v45 = vmul.f32 1.442695, %v469_v44 }
 0x2f8   : > { %1556 = vpow2.f32 %v470_v45 }
 0x2fb   : > { %v580_v46 = vpop.xlane.xlu0 %579 }
 0x2fc   : > { %v581_v47 = vsub.f32 %v572_v28, %v580_v46 }
 0x2fe   : > { %v582_v48 = vmul.f32 1.442695, %v581_v47 }
 0x300   : > { %1558 = vpow2.f32 %v582_v48  ;;  %v1550_v48 = vld [vmem:[#allocation3] sm:$0xff]  }
 0x302   : > { %v1557_v49 = vpop.eup %1556 }
 0x303   : > { %v696_v50 = vpop.xlane.xlu0 %695  ;;  %v472_v51 = vsel %vm419_vm2, %v1557_v49, 0.0 }
 0x304   : > { %v697_v52 = vsub.f32 %v688_v33, %v696_v50  ;;  %473 = vadd.xlane.f32.xlu0 %v472_v51  ;;  %v1548_v33 = vld [vmem:[%s2074_s3] sm:$0xff]   ;;  %v1553_v51 = vld [vmem:[%s2078_s7 + $0x8] sm:$0xff]  }
 0x305   : > { %1451 = vmatpush3.bf16.msra.mxu1 %v1548_v33  ;;  %v1552_v50 = vld [vmem:[%s2078_s7] sm:$0xff]  }
 0x306   : > { %v698_v53 = vmul.f32 1.442695, %v697_v52  ;;  %1452 = vmatprep.subr.bf16.mxu1 %v1671_v0  ;;  %v346_v52 = vlaneseq }
 0x308   : > { %1560 = vpow2.f32 %v698_v53  ;;  %v1346_v53 = vld [vmem:[%s2075_s4] ss:$0 sm:$0xff] }
 0x309   : > { %1453 = vmatpush3.bf16.msra.mxu1 %v1549_v34 }
 0x30a   : > { %v1559_v54 = vpop.eup %1558  ;;  %1466 = vmatprep.subr.bf16.mxu1 %v1671_v0 }
 0x30b   : > { %v584_v55 = vsel %vm419_vm2, %v1559_v54, 0.0  ;;  %v812_v58 = vpop.xlane.xlu1 %811 }
 0x30c   : > { %585 = vadd.xlane.f32.xlu1 %v584_v55  ;;  %v813_v59 = vsub.f32 %v804_v38, %v812_v58  ;;  %v1936_v55 = vshrl.u32 %v346_v52, 7 }
 0x30e   : > { %v814_v60 = vmul.f32 1.442695, %v813_v59  ;;  %vm950_vm7 = vcmp.ge.s32.totalorder %v1936_v55, 7  ;;  %vm959_vm8 = vcmp.ge.s32.totalorder %v1936_v55, 6  ;;  %vm967_vm9 = vcmp.ge.s32.totalorder %v1936_v55, 5 }
 0x30f   : > { %vm974_vm10 = vcmp.ge.s32.totalorder %v1936_v55, 4  ;;  %vm982_vm11 = vcmp.ge.s32.totalorder %v1936_v55, 3  ;;  %vm990_vm12 = vcmp.ge.s32.totalorder %v1936_v55, 2  ;;  %vm998_vm13 = vcmp.ge.s32.totalorder %v1936_v55, 1 }
 0x310   : > { %1562 = vpow2.f32 %v814_v60  ;;  %vm1004_vm14 = vcmp.lt.s32.totalorder %v1936_v55, 7  ;;  %vm1008_vm15 = vcmp.lt.s32.totalorder %v1936_v55, 6 }
 0x312   : > { %v1561_v56 = vpop.eup %1560 }
 0x313   : > { %v700_v57 = vsel %vm419_vm2, %v1561_v56, 0.0 }
 0x314   : > { %701 = vadd.xlane.f32.xlu0 %v700_v57 }
 0x31a   : > { %v1563_v61 = vpop.eup %1562 }
 0x31b   : > { %v816_v62 = vsel %vm419_vm2, %v1563_v61, 0.0 }
 0x31d   : > { %590 = vrot.lane.b32.xlu1 %v1850_v10, %s1680_s16 }
 0x32a   : > { %478 = vrot.lane.b32.xlu0 %v1850_v10, %s1681_s17  ;;  %s336_s17 = sand.u32 1, %s1658_s10  }
 0x32e   : > { %822 = vrot.lane.b32.xlu0 %v1850_v10, %s1682_s22  ;;  %s1332_s22 = sshll.u32 %s336_s17, 3 }
 0x341   : > { %817 = vadd.xlane.f32.xlu1 %v816_v62 }
 0x352   : > { %706 = vrot.lane.b32.xlu1 %v1850_v10, %s1683_s25  ;;  %s1361_s25 = sshll.u32 %s1759_s13, 7  ;;  %s1687_s13 = smov [#allocation6]  }
 0x353   : > { %s2028_s24 = scalar_lea.hbm %s2080_s9, %s1361_s25  ;;  %s1604_s14 = sshll.u32 %s1687_s13, 4  ;;  %s1605_s14 = int_to_ptr.vmem [resolvable:$false] %s1604_s14 }
 0x354   : > { %s1606_s16 = scalar_lea.vmem %s1605_s14, 256 }
 0x391   : > { %v474_v63 = vpop.xlane.xlu0 %473 }
 0x392   : > { %1564 = vrcp.f32 %v474_v63 }
 0x399   : > { %v586_v1 = vpop.xlane.xlu1 %585 }
 0x39a   : > { %1566 = vrcp.f32 %v586_v1 }
 0x39c   : > { %v1565_v2 = vpop.eup %1564 }
 0x39d   : > { %v476_v5 = vmul.f32 %v1565_v2, %v1557_v49  ;;  %v591_v8 = vpop.permute.xlu1 %590  ;;  %v1551_v49 = vld [vmem:[#allocation3 + $0x8] sm:$0xff]  }
 0x39e   : > { %v596_v12 = vsel %vm483_vm3, %v591_v8, 0 }
 0x39f   : > { %v477_v9 = vpack.c.bf16 %v476_v5, %v476_v5 }
 0x3a1   : > { %v702_v4 = vpop.xlane.xlu0 %701 }
 0x3a2   : > { %1568 = vrcp.f32 %v702_v4 }
 0x3a4   : > { %v1567_v11 = vpop.eup %1566 }
 0x3a5   : > { %v479_v6 = vpop.permute.xlu0 %478  ;;  %v588_v10 = vmul.f32 %v1567_v11, %v1559_v54 }
 0x3a6   : > { %v485_v7 = vsel %vm483_vm3, %v479_v6, 0 }
 0x3a7   : > { %1409 = vmatpush3.bf16.msra.mxu0 %v485_v7  ;;  %v589_v13 = vpack.c.bf16 %v588_v10, %v588_v10 }
 0x3a8   : > { %1420 = vmatprep.subr.bf16.mxu0 %v1671_v0 }
 0x3a9   : > { %v823_v19 = vpop.permute.xlu0 %822 }
 0x3aa   : > { %1411 = vmatmul.mubr.msk.bf16.vlgmr.msra.gmra.mrb[4].mxu0 %vm419_vm2, %v477_v9  ;;  %v828_v21 = vsel %vm483_vm3, %v823_v19, 0 }
 0x3ab   : > { %1421 = vmatpush3.bf16.msra.mxu0 %v596_v12  ;;  %1422 = vmatprep.mubr.msk.bf16.mxu0 %vm1672_vm0, %v1671_v0 }
 0x3ac   : > { %1432 = vmatprep.subr.bf16.mxu0 %v1671_v0  ;;  %v1569_v14 = vpop.eup %1568 }
 0x3ad   : > { %v704_v16 = vmul.f32 %v1569_v14, %v1561_v56 }
 0x3af   : > { %v705_v20 = vpack.c.bf16 %v704_v16, %v704_v16 }
 0x3b2   : > { %1423 = vmatmul.mubr.msk.bf16.vlgmr.msra.gmra.mrb[8].mxu0 %vm419_vm2, %v589_v13 }
 0x3b3   : > { %1434 = vmatprep.mubr.msk.bf16.mxu0 %vm1672_vm0, %v1671_v0 }
 0x3ce   : > { %v818_v15 = vpop.xlane.xlu1 %817 }
 0x3cf   : > { %1570 = vrcp.f32 %v818_v15 }
 0x3d2   : > { %v707_v17 = vpop.permute.xlu1 %706 }
 0x3d3   : > { %v712_v18 = vsel %vm483_vm3, %v707_v17, 0  ;;  %vm1020_vm3 = vcmp.lt.s32.totalorder %v1936_v55, 3 }
 0x3d4   : > { %1433 = vmatpush3.bf16.msra.mxu0 %v712_v18 }
 0x3d5   : > { %1444 = vmatprep.subr.bf16.mxu0 %v1671_v0 }
 0x3d7   : > { %1435 = vmatmul.mubr.msk.bf16.vlgmr.msra.gmra.mrb[12].mxu0 %vm419_vm2, %v705_v20 }
 0x3d8   : > { %1445 = vmatpush3.bf16.msra.mxu0 %v828_v21  ;;  %1446 = vmatprep.mubr.msk.bf16.mxu0 %vm1672_vm0, %v1671_v0 }
 0x3d9   : > { %v1571_v22 = vpop.eup %1570  ;;  %1458 = vmatprep.subr.bf16.mxu0 %v1671_v0 }
 0x3da   : > { %v820_v23 = vmul.f32 %v1571_v22, %v1563_v61 }
 0x3dc   : > { %v821_v24 = vpack.c.bf16 %v820_v23, %v820_v23 }
 0x3df   : > { %1447 = vmatmul.mubr.msk.bf16.vlgmr.msra.gmra.mrb[16].mxu0 %vm419_vm2, %v821_v24 }
 0x3e0   : > { %1462 = vmatprep.mubr.msk.bf16.mxu0 %vm1672_vm0, %v1671_v0  ;;  %1459 = vmatpush3.bf16.msra.mxu0 %v1550_v48 }
 0x3e1   : > { %1460 = vmatprep.subr.bf16.mxu0 %v1671_v0 }
 0x3e4   : > { %1461 = vmatpush3.bf16.msra.mxu0 %v1551_v49 }
 0x47d   : > { %v521_v25 = vpop.f32.mrb[4].mxu0 }
 0x47e   : > { %527 = vst.msk [vmem:[#allocation2] sm:$0xff] %vm419_vm2, %v521_v25  ;;  %v1412_v26 = vpop.f32.mrb[5].mxu0  ;;  %vm1016_vm2 = vcmp.lt.s32.totalorder %v1936_v55, 4 }
 0x47f   : > { %v524_v27 = vpop.f32.mrb[6].mxu0 }
 0x480   : > { %v1413_v28 = vpop.f32.mrb[7].mxu0 }
 0x485   : > { %v632_v29 = vpop.f32.mrb[8].mxu0 }
 0x486   : > { %639 = vrot.lane.b32.xlu1 %v632_v29, %s1684_s26  ;;  %v1424_v30 = vpop.f32.mrb[9].mxu0  ;;  %s338_s26 = scalar_lea.vmem [#allocation6], %s1332_s22 }
 0x487   : > { %v635_v31 = vpop.f32.mrb[10].mxu0  ;;  %s1255_s28 = sshll.u32 %s338_s26, 4  ;;  %s2030_s28 = int_to_ptr.vmem [resolvable:$true] %s1255_s28 }
 0x488   : > { %v1425_v32 = vpop.f32.mrb[11].mxu0  ;;  %p1607_p2 = scmp.lt.s32.totalorder %s2030_s28, %s1605_s14 }
 0x4aa   : > { %v748_v35 = vpop.f32.mrb[12].mxu0 }
 0x4ab   : > { %755 = vrot.lane.b32.xlu0 %v748_v35, %s1685_s27  ;;  %v1436_v36 = vpop.f32.mrb[13].mxu0  ;;  %s1242_s27 = scalar_lea.sflag [#allocation5], %s336_s17 }
 0x4ac   : > { %v751_v37 = vpop.f32.mrb[14].mxu0  ;;  %v1554_v36 = vld [vmem:[%s2078_s7 + $0x10] sm:$0xff]  }
 0x4ad   : > { %v1437_v38 = vpop.f32.mrb[15].mxu0  ;;  %v1555_v37 = vld [vmem:[%s2078_s7 + $0x18] sm:$0xff]  }
 0x4ae   : > { %v1350_v38 = vld [vmem:[%s2077_s6] ss:$0 sm:$0xff] }
 0x4b2   : > { %v864_v39 = vpop.f32.mrb[16].mxu0 }
 0x4b3   : > { %871 = vrot.lane.b32.xlu1 %v864_v39, %s1686_s29  ;;  %v1448_v40 = vpop.f32.mrb[17].mxu0  ;;  %s1600_s29 = scalar_lea.vmem %s2030_s28, 128 }
 0x4b4   : > { %v867_v41 = vpop.f32.mrb[18].mxu0  ;;  %p1601_p6 = scmp.ne.s32.totalorder %s2030_s28, %s1600_s29  ;;  %p1608_p3 = scmp.lt.s32.totalorder %s1606_s16, %s1600_s29 }
 0x4b5   : > { %v1449_v42 = vpop.f32.mrb[19].mxu0 }
 0x4b6   : > { %p1602_p10 = pnand %p1601_p6, %p2091_p9  ;;  %p1609_p4 = por %p1608_p3, %p1607_p2 }
 0x4b8   : > { %p1603_p12 = pneg %p1602_p10 }
 0x4ba   : > { %p1610_p7 = pnand %p1609_p4, %p1603_p12 }
 0x4f8   : > { %v640_v43 = vpop.permute.xlu1 %639 }
 0x4f9   : > { %643 = vst.msk [vmem:[#allocation2] sm:$0xff] %vm642_vm4, %v640_v43  ;;  %vm1024_vm4 = vcmp.lt.s32.totalorder %v1936_v55, 2 }
 0x51d   : > { %v756_v44 = vpop.permute.xlu0 %755 }
 0x51e   : > { %759 = vst.msk [vmem:[#allocation2] sm:$0xff] %vm758_vm5, %v756_v44  ;;  %vm1028_vm5 = vcmp.lt.s32.totalorder %v1936_v55, 1 }
 0x525   : > { %v872_v45 = vpop.permute.xlu1 %871 }
 0x526   : > { %875 = vst.msk [vmem:[#allocation2] sm:$0xff] %vm874_vm6, %v872_v45  ;;  %vm1142_vm6 = vcmask 523264  }
 0x52d   : > { %v876_v46 = vld [vmem:[#allocation2] sm:$0xff] }
 0x52e   : > { %v877_v47 = vpack.c.bf16 %v876_v46, %v876_v46 }
 0x530   : > { %1455 = vmatmul.mubr.msk.bf16.vlgmr.msra.gmra.mrb[16].mxu1 %vm371_vm1, %v877_v47 }
 0x531   : > { %1474 = vmatprep.mubr.msk.bf16.mxu1 %vm1672_vm0, %v1671_v0  ;;  %1467 = vmatpush3.bf16.msra.mxu1 %v1552_v50  ;;  %vm1012_vm0 = vcmp.lt.s32.totalorder %v1936_v55, 5 }
 0x532   : > { %1468 = vmatprep.subr.bf16.mxu1 %v1671_v0 }
 0x535   : > { %1469 = vmatpush3.bf16.msra.mxu1 %v1553_v51 }
 0x536   : > { %1470 = vmatprep.subr.bf16.mxu1 %v1671_v0 }
 0x539   : > { %1471 = vmatpush3.bf16.msra.mxu1 %v1554_v36 }
 0x53a   : > { %1472 = vmatprep.subr.bf16.mxu1 %v1671_v0  ;;  %v1354_v0 = vld [vmem:[%s2079_s8] ss:$0 sm:$0xff] }
 0x53d   : > { %1473 = vmatpush3.bf16.msra.mxu1 %v1555_v37 }
 0x603   : > { %v938_v54 = vpop.f32.mrb[16].mxu1 }
 0x604   : > { %v939_v56 = vadd.f32 %v1346_v53, %v938_v54  ;;  %v1456_v57 = vpop.f32.mrb[17].mxu1 }
 0x605   : > { %v941_v58 = vpop.f32.mrb[18].mxu1 }
 0x606   : > { %v944_v59 = vadd.f32 %v939_v56, %v1838_v3  ;;  %v1457_v60 = vpop.f32.mrb[19].mxu1 }
 0x608   : > { %v946_v61 = vrot.slane %v944_v59, 1  ;;  %v955_v62 = vrot.slane %v944_v59, 2  ;;  %v963_v63 = vrot.slane %v944_v59, 3  ;;  %v971_v4 = vrot.slane %v944_v59, 4 }
 0x609   : > { %v978_v6 = vrot.slane %v944_v59, 5  ;;  %v986_v9 = vrot.slane %v944_v59, 6  ;;  %v994_v10 = vrot.slane %v944_v59, 7 }
 0x60a   : > { %v953_v1 = vsel %vm950_vm7, %v946_v61, 0.0  ;;  %v961_v2 = vsel %vm959_vm8, %v955_v62, 0.0  ;;  %v969_v3 = vsel %vm967_vm9, %v963_v63, 0.0  ;;  %v976_v8 = vsel %vm974_vm10, %v971_v4, 0.0 }
 0x60b   : > { %v962_v5 = vadd.f32 %v961_v2, %v953_v1  ;;  %v984_v12 = vsel %vm982_vm11, %v978_v6, 0.0  ;;  %v992_v14 = vsel %vm990_vm12, %v986_v9, 0.0  ;;  %v1000_v16 = vsel %vm998_vm13, %v994_v10, 0.0 }
 0x60c   : > { %v1006_v19 = vsel %vm1004_vm14, %v946_v61, 0.0  ;;  %v1010_v21 = vsel %vm1008_vm15, %v955_v62, 0.0  ;;  %v1014_v23 = vsel %vm1012_vm0, %v963_v63, 0.0  ;;  %v1018_v25 = vsel %vm1016_vm2, %v971_v4, 0.0 }
 0x60d   : > { %v970_v7 = vadd.f32 %v969_v3, %v962_v5  ;;  %v1022_v27 = vsel %vm1020_vm3, %v978_v6, 0.0  ;;  %v1026_v29 = vsel %vm1024_vm4, %v986_v9, 0.0  ;;  %v1030_v31 = vsel %vm1028_vm5, %v994_v10, 0.0 }
 0x60f   : > { %v977_v11 = vadd.f32 %v976_v8, %v970_v7 }
 0x611   : > { %v985_v13 = vadd.f32 %v984_v12, %v977_v11 }
 0x613   : > { %v993_v15 = vadd.f32 %v992_v14, %v985_v13 }
 0x615   : > { %v1001_v17 = vadd.f32 %v1000_v16, %v993_v15 }
 0x617   : > { %v1002_v18 = vadd.f32 %v1001_v17, %v944_v59 }
 0x619   : > { %v1007_v20 = vadd.f32 %v1006_v19, %v1002_v18 }
 0x61b   : > { %v1011_v22 = vadd.f32 %v1010_v21, %v1007_v20 }
 0x61d   : > { %v1015_v24 = vadd.f32 %v1014_v23, %v1011_v22 }
 0x61f   : > { %v1019_v26 = vadd.f32 %v1018_v25, %v1015_v24 }
 0x621   : > { %v1023_v28 = vadd.f32 %v1022_v27, %v1019_v26 }
 0x623   : > { %v1027_v30 = vadd.f32 %v1026_v29, %v1023_v28 }
 0x625   : > { %v1031_v32 = vadd.f32 %v1030_v31, %v1027_v30 }
 0x627   : > { %v1032_v33 = vmul.f32 0.041666668, %v1031_v32 }
 0x629   : > { %v1033_v34 = vsub.f32 %v944_v59, %v1032_v33 }
 0x62b   : > { %v1034_v35 = vpack.c.bf16 %v1033_v34, %v1033_v34 }
 0x62d   : > { %1463 = vmatmul.mubr.msk.bf16.vlgmr.msra.gmra.mrb[20].mxu0 %vm371_vm1, %v1034_v35 }
 0x700   : > { %v1095_v39 = vpop.f32.mrb[20].mxu0 }
 0x701   : > { %v1096_v40 = vadd.f32 %v1350_v38, %v1095_v39  ;;  %v1464_v41 = vpop.f32.mrb[21].mxu0 }
 0x702   : > { %v1098_v42 = vpop.f32.mrb[22].mxu0 }
 0x703   : > { %v1101_v43 = vmax.f32 %v1096_v40, 0.0  ;;  %v1465_v44 = vpop.f32.mrb[23].mxu0 }
 0x705   : > { %v1102_v45 = vpack.c.bf16 %v1101_v43, %v1101_v43 }
 0x707   : > { %1475 = vmatmul.mubr.msk.bf16.vlgmr.msra.gmra.mrb[20].mxu1 %vm1142_vm6, %v1102_v45 }
 0x7da   : > { %v1180_v46 = vpop.f32.mrb[20].mxu1 }
 0x7db   : > { %v1181_v47 = vadd.f32 %v1354_v0, %v1180_v46  ;;  %v1476_v48 = vpop.f32.mrb[21].mxu1 }
 0x7dc   : > { %v1183_v49 = vpop.f32.mrb[22].mxu1 }
 0x7dd   : > { %v1186_v50 = vadd.f32 %v1181_v47, %v1033_v34  ;;  %v1477_v51 = vpop.f32.mrb[23].mxu1 }
 0x7df   : > { %v1188_v52 = vrot.slane %v1186_v50, 1  ;;  %v1193_v53 = vrot.slane %v1186_v50, 2  ;;  %v1198_v54 = vrot.slane %v1186_v50, 3  ;;  %v1203_v58 = vrot.slane %v1186_v50, 4 }
 0x7e0   : > { %v1208_v61 = vrot.slane %v1186_v50, 5  ;;  %v1213_v1 = vrot.slane %v1186_v50, 6  ;;  %v1218_v5 = vrot.slane %v1186_v50, 7 }
 0x7e1   : > { %v1191_v56 = vsel %vm950_vm7, %v1188_v52, 0.0  ;;  %v1196_v57 = vsel %vm959_vm8, %v1193_v53, 0.0  ;;  %v1201_v60 = vsel %vm967_vm9, %v1198_v54, 0.0  ;;  %v1206_v63 = vsel %vm974_vm10, %v1203_v58, 0.0 }
 0x7e2   : > { %v1197_v59 = vadd.f32 %v1196_v57, %v1191_v56  ;;  %v1211_v4 = vsel %vm982_vm11, %v1208_v61, 0.0  ;;  %v1216_v6 = vsel %vm990_vm12, %v1213_v1, 0.0  ;;  %v1221_v8 = vsel %vm998_vm13, %v1218_v5, 0.0 }
 0x7e3   : > { %v1224_v12 = vsel %vm1004_vm14, %v1188_v52, 0.0  ;;  %v1226_v13 = vsel %vm1008_vm15, %v1193_v53, 0.0  ;;  %v1228_v15 = vsel %vm1012_vm0, %v1198_v54, 0.0  ;;  %v1230_v17 = vsel %vm1016_vm2, %v1203_v58, 0.0 }
 0x7e4   : > { %v1202_v62 = vadd.f32 %v1201_v60, %v1197_v59  ;;  %v1232_v19 = vsel %vm1020_vm3, %v1208_v61, 0.0  ;;  %v1234_v21 = vsel %vm1024_vm4, %v1213_v1, 0.0  ;;  %v1236_v23 = vsel %vm1028_vm5, %v1218_v5, 0.0 }
 0x7e6   : > { %v1207_v2 = vadd.f32 %v1206_v63, %v1202_v62 }
 0x7e8   : > { %v1212_v3 = vadd.f32 %v1211_v4, %v1207_v2 }
 0x7ea   : > { %v1217_v7 = vadd.f32 %v1216_v6, %v1212_v3 }
 0x7ec   : > { %v1222_v9 = vadd.f32 %v1221_v8, %v1217_v7 }
 0x7ee   : > { %v1223_v11 = vadd.f32 %v1222_v9, %v1186_v50 }
 0x7f0   : > { %v1225_v10 = vadd.f32 %v1224_v12, %v1223_v11 }
 0x7f2   : > { %v1227_v14 = vadd.f32 %v1226_v13, %v1225_v10 }
 0x7f4   : > { %v1229_v16 = vadd.f32 %v1228_v15, %v1227_v14 }
 0x7f6   : > { %v1231_v18 = vadd.f32 %v1230_v17, %v1229_v16 }
 0x7f8   : > { %v1233_v20 = vadd.f32 %v1232_v19, %v1231_v18 }
 0x7fa   : > { %v1235_v22 = vadd.f32 %v1234_v21, %v1233_v20 }
 0x7fc   : > { %v1237_v24 = vadd.f32 %v1236_v23, %v1235_v22 }
 0x7fe   : > { %v1238_v25 = vmul.f32 0.041666668, %v1237_v24 }
 0x800   : > { %v1239_v26 = vsub.f32 %v1186_v50, %v1238_v25 }
 0x802   : > { %1240 = vst.msk [vmem:[%s338_s26] sm:$0xff] %vm371_vm1, %v1239_v26 }
 0x803   : > { %1613 = shalt.err (!%p1610_p7)
}
 0x804   : > { %s1614_s17 = scalar_lea.hbm %s2028_s24, 128  ;;  %s1618_s26 = scalar_lea.hbm %s2080_s9, 256 }
 0x805   : > { %p1615_p8 = scmp.ne.s32.totalorder %s2028_s24, %s1614_s17  ;;  %p1619_p1 = scmp.lt.u32.totalorder %s2028_s24, %s2080_s9 }
 0x806   : > { %p1620_p0 = scmp.lt.u32.totalorder %s1618_s26, %s1614_s17  ;;  %p1622_p6 = scmp.lt.u32.totalorder %s1614_s17, %s2028_s24 }
 0x807   : > { %p1616_p11 = pnand %p1615_p8, %p2091_p9 }
 0x808   : > { %p1621_p5 = por %p1620_p0, %p1619_p1 }
 0x809   : > { %p1617_p13 = pneg %p1616_p11 }
 0x80a   : > { %p1623_p10 = por %p1622_p6, %p1621_p5 }
 0x80c   : > { %p1624_p12 = pnand %p1623_p10, %p1617_p13 }
 0x80e   : > { %1627 = shalt.err (!%p1624_p12)
}
 0x80f   : > { %1482 = dma.vmem_to_hbm [thread:$0]  (%p2091_p9), %s2030_s28, 128, %s2028_s24, %s1242_s27  }
 0x810 PF: > { %p1494_p2 = scmp.ge.s32.totalorder %s1666_s12, 2  ;;  %s1267_s29 = sand.u32 1, %s1654_s30  }
 0x811   : > { %p2092_p3 = scmp.ne.s32.totalorder %s2085_s20, 0  ;;  %s1268_s13 = scalar_lea.sflag [#allocation5], %s1267_s29 }
 0x813   : > { %p1489_p4 = pnand %p1494_p2, %p2092_p3 }
 0x815   : > { %1649 = dma.done.wait (!%p1489_p4), %s1268_s13, 128  }
 0x816   : > { %1651 = vsyncadd (!%p1489_p4), %s1268_s13, 4294967168  ;;  %p20_p7 = scmp.ge.s32.totalorder %s1763_s15, 4   ;;  %s2093_s30 = smov %s1658_s10 }
 0x817   : > { %s2094_s10 = smov %s1662_s11  ;;  %s2095_s11 = smov %s1774_s18 }
 0x818   : > { %s2096_s12 = smov %s1763_s15  ;;  %22 = sbr.rel (!%p20_p7) target bundleno = 4 (0x4), region = 96 }
 0x81f   :  { %1273 = vsyncpa [#allocation4], 1 }
 0x820   :  { %1275 = vsyncpa [#allocation4 + $0x1], 1 }
 0x821   :  { %1276 = vsyncpa [#allocation5], 1 }
 0x822   :  { %1278 = vsyncpa [#allocation5 + $0x1], 1 }

</bundles_post_ra>
